<compile_context>
chip_gen: v5e
topology: v5e:2x2
jax: 0.10.0
libtpu: 0.0.40
codegen_flags: <defaults>
</compile_context>

<pallas_src>
import numpy as np
import jax
import jax.numpy as jnp
from jax.experimental import pallas as pl
from jax.experimental.pallas import tpu as pltpu

N = 48
OUT = N + 1          # conv2 output height/width (49)
LANES = 128          # lane-dense output width


def _net_kernel(x9_ref, w1_ref, wlt_ref, bl_ref, scal_ref, out_ref,
                yrow_ref, ypad_ref):
    # scal_ref (SMEM, (6,)): [conv1_b, w2_00, w2_01, w2_10, w2_11, conv_b]

    # --- conv1 (3x3, stride 3) == (1,9) @ (9,N) MXU dot ------------------
    v = (jnp.dot(w1_ref[...], x9_ref[...], preferred_element_type=jnp.float32)
         + scal_ref[0])                                              # (1, N)

    # --- linear (N -> N*N) == (1,N) @ (N,N*N) MXU dot --------------------
    yrow_ref[...] = (jnp.dot(v, wlt_ref[...],
                             preferred_element_type=jnp.float32)
                     + bl_ref[...])                                  # (1, N*N)

    # --- build the zero-padded (N+2, N+2) plane in VMEM (padding = 1) ----
    # Zeroing the whole lane-padded scratch supplies all four zero borders;
    # the 48 static row copies realise the (1, N*N) -> (N, N) relayout
    # through VMEM (no in-register reshape needed).
    ypad_ref[...] = jnp.zeros_like(ypad_ref)
    for i in range(N):                                   # static, unrolled
        ypad_ref[i + 1:i + 2, 1:N + 1] = yrow_ref[0:1, i * N:(i + 1) * N]

    # --- conv (2x2, stride 1, padding 1): 4 shifted-slice FMAs on the VPU
    w00 = scal_ref[1]
    w01 = scal_ref[2]
    w10 = scal_ref[3]
    w11 = scal_ref[4]
    b2 = scal_ref[5]
    out_ref[...] = (w00 * ypad_ref[0:OUT, 0:LANES]
                    + w01 * ypad_ref[0:OUT, 1:LANES + 1]
                    + w10 * ypad_ref[1:OUT + 1, 0:LANES]
                    + w11 * ypad_ref[1:OUT + 1, 1:LANES + 1]
                    + b2)


def prepare_params(params):
    """One-time (hoisted) parameter preprocessing — NOT on the per-call path."""
    return {
        "w1_row": params["conv1_w"].reshape(1, 9).astype(jnp.float32),
        "wlt": params["lin_w"].T.astype(jnp.float32),              # (N, N*N)
        "bl_row": params["lin_b"].reshape(1, N * N).astype(jnp.float32),
        "scal": jnp.concatenate(
            [params["conv1_b"].reshape(1),
             params["conv_w"].reshape(4),
             params["conv_b"].reshape(1)]).astype(jnp.float32),    # (6,)
    }


@jax.jit
def net_forward(x, prep):
    # im2col for conv1 (432 floats, tiny JAX glue inside the same jit):
    # patch dim (di, dj) row-major  x  conv1 output width j.
    x2d = x.reshape(3, 3 * N)
    x9 = x2d.reshape(3, N, 3).transpose(0, 2, 1).reshape(9, N)     # (9, N)

    out_pad = pl.pallas_call(
        _net_kernel,
        out_shape=jax.ShapeDtypeStruct((OUT, LANES), jnp.float32),
        in_specs=[
            pl.BlockSpec(memory_space=pltpu.MemorySpace.VMEM),     # x9
            pl.BlockSpec(memory_space=pltpu.MemorySpace.VMEM),     # w1 row
            pl.BlockSpec(memory_space=pltpu.MemorySpace.VMEM),     # W_lin^T
            pl.BlockSpec(memory_space=pltpu.MemorySpace.VMEM),     # lin bias row
            pl.BlockSpec(memory_space=pltpu.MemorySpace.SMEM),     # packed scalars
        ],
        out_specs=pl.BlockSpec(memory_space=pltpu.MemorySpace.VMEM),
        scratch_shapes=[
            pltpu.VMEM((1, N * N), jnp.float32),          # linear output row
            pltpu.VMEM((N + 2, 2 * LANES), jnp.float32),  # padded (n+2, .) plane
        ],
        # TODO(synk): if this module is ever run with batch > 1, add a leading
        # batch grid axis with dimension_semantics=("parallel",) to use both
        # TensorCores on v7x.
    )(x9, prep["w1_row"], prep["wlt"], prep["bl_row"], prep["scal"])

    # drop lane padding, restore NCHW
    return out_pad[:, :OUT].reshape(1, 1, OUT, OUT)


def ref_forward(x, params):
    """Pure-JAX reference mirroring the PyTorch forward exactly."""
    x2d = x.reshape(3, 3 * N)
    w1 = params["conv1_w"]
    v = jnp.stack(
        [jnp.sum(x2d[:, 3 * j:3 * j + 3] * w1) for j in range(N)]
    ) + params["conv1_b"][0]
    y = v @ params["lin_w"].T + params["lin_b"]
    y48 = y.reshape(N, N)
    xp = jnp.pad(y48, 1)
    w2 = params["conv_w"]
    out = (
        w2[0, 0] * xp[:-1, :-1]
        + w2[0, 1] * xp[:-1, 1:]
        + w2[1, 0] * xp[1:, :-1]
        + w2[1, 1] * xp[1:, 1:]
        + params["conv_b"][0]
    )
    return out.reshape(1, 1, N + 1, N + 1)


if __name__ == "__main__":
    key = jax.random.PRNGKey(0)
    ks = jax.random.split(key, 7)
    bound_lin = 1.0 / np.sqrt(N)
    params = {
        "conv1_w": jax.random.uniform(ks[0], (3, 3), jnp.float32, -1.0 / 3, 1.0 / 3),
        "conv1_b": jax.random.uniform(ks[1], (1,), jnp.float32, -1.0 / 3, 1.0 / 3),
        "lin_w": jax.random.uniform(ks[2], (N * N, N), jnp.float32, -bound_lin, bound_lin),
        "lin_b": jax.random.uniform(ks[3], (N * N,), jnp.float32, -bound_lin, bound_lin),
        "conv_w": jax.random.uniform(ks[4], (2, 2), jnp.float32, -0.5, 0.5),
        "conv_b": jax.random.uniform(ks[5], (1,), jnp.float32, -0.5, 0.5),
    }
    # Module requires exactly 1*1*3*(3*48) = 432 input elements (n is hard-coded).
    x = jax.random.normal(ks[6], (1, 1, 3, 3 * N), jnp.float32)

    prep = prepare_params(params)            # hoisted one-time preprocessing
    out = net_forward(x, prep)
    out = jax.block_until_ready(out)

    ref = ref_forward(x, params)
    assert out.shape == (1, 1, N + 1, N + 1)
    np.testing.assert_allclose(np.asarray(out), np.asarray(ref), rtol=1e-2, atol=1e-2)

    print("KERNEL_OK")
</pallas_src>

<mosaic_0001>
module attributes {stable_mosaic.version = 11 : i64} {
  func.func @_net_kernel(%arg0: memref<9x48xf32, #tpu.memory_space<vmem>>, %arg1: memref<1x9xf32, #tpu.memory_space<vmem>>, %arg2: memref<48x2304xf32, #tpu.memory_space<vmem>>, %arg3: memref<1x2304xf32, #tpu.memory_space<vmem>>, %arg4: memref<6xf32, #tpu.memory_space<smem>>, %arg5: memref<49x128xf32, #tpu.memory_space<vmem>>, %arg6: memref<1x2304xf32, #tpu.memory_space<vmem>>, %arg7: memref<50x256xf32, #tpu.memory_space<vmem>>) attributes {dimension_semantics = [], scalar_prefetch = 0 : i64, scratch_operands = 2 : i64, tpu.core_type = #tpu.core_type<tc>} {
    %c0 = arith.constant 0 : index
    %c0_0 = arith.constant 0 : index
    %0 = vector.load %arg1[%c0, %c0_0] : memref<1x9xf32, #tpu.memory_space<vmem>>, vector<1x9xf32>
    %c0_1 = arith.constant 0 : index
    %c0_2 = arith.constant 0 : index
    %1 = vector.load %arg0[%c0_1, %c0_2] : memref<9x48xf32, #tpu.memory_space<vmem>>, vector<9x48xf32>
    %cst = arith.constant dense<0.000000e+00> : vector<1x48xf32>
    %2 = tpu.matmul %0, %1, %cst {dimension_numbers = #tpu.dot_dimension_numbers<[1], [0], [0], [1], [0, 0, 1, 1], [], []>} : vector<1x9xf32>, vector<9x48xf32>, vector<1x48xf32> -> vector<1x48xf32>
    %c0_3 = arith.constant 0 : index
    %3 = memref.load %arg4[%c0_3] : memref<6xf32, #tpu.memory_space<smem>>
    %4 = vector.broadcast %3 : f32 to vector<1x48xf32>
    %5 = arith.addf %2, %4 : vector<1x48xf32>
    %c0_4 = arith.constant 0 : index
    %c0_5 = arith.constant 0 : index
    %6 = vector.load %arg2[%c0_4, %c0_5] : memref<48x2304xf32, #tpu.memory_space<vmem>>, vector<48x2304xf32>
    %cst_6 = arith.constant dense<0.000000e+00> : vector<1x2304xf32>
    %7 = tpu.matmul %5, %6, %cst_6 {dimension_numbers = #tpu.dot_dimension_numbers<[1], [0], [0], [1], [0, 0, 1, 1], [], []>} : vector<1x48xf32>, vector<48x2304xf32>, vector<1x2304xf32> -> vector<1x2304xf32>
    %c0_7 = arith.constant 0 : index
    %c0_8 = arith.constant 0 : index
    %8 = vector.load %arg3[%c0_7, %c0_8] : memref<1x2304xf32, #tpu.memory_space<vmem>>, vector<1x2304xf32>
    %9 = arith.addf %7, %8 : vector<1x2304xf32>
    %c0_9 = arith.constant 0 : index
    %c0_10 = arith.constant 0 : index
    %10 = vector.load %arg6[%c0_9, %c0_10] : memref<1x2304xf32, #tpu.memory_space<vmem>>, vector<1x2304xf32>
    tpu.vector_store %arg6[%c0_9, %c0_10], %9 {strides = array<i32>} : memref<1x2304xf32, #tpu.memory_space<vmem>>, vector<1x2304xf32>,
    %cst_11 = arith.constant 0.000000e+00 : f32
    %11 = vector.broadcast %cst_11 : f32 to vector<50x256xf32>
    %c0_12 = arith.constant 0 : index
    %c0_13 = arith.constant 0 : index
    %12 = vector.load %arg7[%c0_12, %c0_13] : memref<50x256xf32, #tpu.memory_space<vmem>>, vector<50x256xf32>
    tpu.vector_store %arg7[%c0_12, %c0_13], %11 {strides = array<i32>} : memref<50x256xf32, #tpu.memory_space<vmem>>, vector<50x256xf32>,
    %c0_14 = arith.constant 0 : index
    %c0_15 = arith.constant 0 : index
    %13 = vector.load %arg6[%c0_14, %c0_15] : memref<1x2304xf32, #tpu.memory_space<vmem>>, vector<1x48xf32>
    %c1 = arith.constant 1 : index
    %c1_16 = arith.constant 1 : index
    %14 = vector.load %arg7[%c1, %c1_16] : memref<50x256xf32, #tpu.memory_space<vmem>>, vector<1x48xf32>
    tpu.vector_store %arg7[%c1, %c1_16], %13 {strides = array<i32>} : memref<50x256xf32, #tpu.memory_space<vmem>>, vector<1x48xf32>,
    %c0_17 = arith.constant 0 : index
    %c48 = arith.constant 48 : index
    %15 = vector.load %arg6[%c0_17, %c48] : memref<1x2304xf32, #tpu.memory_space<vmem>>, vector<1x48xf32>
    %c2 = arith.constant 2 : index
    %c1_18 = arith.constant 1 : index
    %16 = vector.load %arg7[%c2, %c1_18] : memref<50x256xf32, #tpu.memory_space<vmem>>, vector<1x48xf32>
    tpu.vector_store %arg7[%c2, %c1_18], %15 {strides = array<i32>} : memref<50x256xf32, #tpu.memory_space<vmem>>, vector<1x48xf32>,
    %c0_19 = arith.constant 0 : index
    %c96 = arith.constant 96 : index
    %17 = vector.load %arg6[%c0_19, %c96] : memref<1x2304xf32, #tpu.memory_space<vmem>>, vector<1x48xf32>
    %c3 = arith.constant 3 : index
    %c1_20 = arith.constant 1 : index
    %18 = vector.load %arg7[%c3, %c1_20] : memref<50x256xf32, #tpu.memory_space<vmem>>, vector<1x48xf32>
    tpu.vector_store %arg7[%c3, %c1_20], %17 {strides = array<i32>} : memref<50x256xf32, #tpu.memory_space<vmem>>, vector<1x48xf32>,
    %c0_21 = arith.constant 0 : index
    %c144 = arith.constant 144 : index
    %19 = vector.load %arg6[%c0_21, %c144] : memref<1x2304xf32, #tpu.memory_space<vmem>>, vector<1x48xf32>
    %c4 = arith.constant 4 : index
    %c1_22 = arith.constant 1 : index
    %20 = vector.load %arg7[%c4, %c1_22] : memref<50x256xf32, #tpu.memory_space<vmem>>, vector<1x48xf32>
    tpu.vector_store %arg7[%c4, %c1_22], %19 {strides = array<i32>} : memref<50x256xf32, #tpu.memory_space<vmem>>, vector<1x48xf32>,
    %c0_23 = arith.constant 0 : index
    %c192 = arith.constant 192 : index
    %21 = vector.load %arg6[%c0_23, %c192] : memref<1x2304xf32, #tpu.memory_space<vmem>>, vector<1x48xf32>
    %c5 = arith.constant 5 : index
    %c1_24 = arith.constant 1 : index
    %22 = vector.load %arg7[%c5, %c1_24] : memref<50x256xf32, #tpu.memory_space<vmem>>, vector<1x48xf32>
    tpu.vector_store %arg7[%c5, %c1_24], %21 {strides = array<i32>} : memref<50x256xf32, #tpu.memory_space<vmem>>, vector<1x48xf32>,
    %c0_25 = arith.constant 0 : index
    %c240 = arith.constant 240 : index
    %23 = vector.load %arg6[%c0_25, %c240] : memref<1x2304xf32, #tpu.memory_space<vmem>>, vector<1x48xf32>
    %c6 = arith.constant 6 : index
    %c1_26 = arith.constant 1 : index
    %24 = vector.load %arg7[%c6, %c1_26] : memref<50x256xf32, #tpu.memory_space<vmem>>, vector<1x48xf32>
    tpu.vector_store %arg7[%c6, %c1_26], %23 {strides = array<i32>} : memref<50x256xf32, #tpu.memory_space<vmem>>, vector<1x48xf32>,
    %c0_27 = arith.constant 0 : index
    %c288 = arith.constant 288 : index
    %25 = vector.load %arg6[%c0_27, %c288] : memref<1x2304xf32, #tpu.memory_space<vmem>>, vector<1x48xf32>
    %c7 = arith.constant 7 : index
    %c1_28 = arith.constant 1 : index
    %26 = vector.load %arg7[%c7, %c1_28] : memref<50x256xf32, #tpu.memory_space<vmem>>, vector<1x48xf32>
    tpu.vector_store %arg7[%c7, %c1_28], %25 {strides = array<i32>} : memref<50x256xf32, #tpu.memory_space<vmem>>, vector<1x48xf32>,
    %c0_29 = arith.constant 0 : index
    %c336 = arith.constant 336 : index
    %27 = vector.load %arg6[%c0_29, %c336] : memref<1x2304xf32, #tpu.memory_space<vmem>>, vector<1x48xf32>
    %c8 = arith.constant 8 : index
    %c1_30 = arith.constant 1 : index
    %28 = vector.load %arg7[%c8, %c1_30] : memref<50x256xf32, #tpu.memory_space<vmem>>, vector<1x48xf32>
    tpu.vector_store %arg7[%c8, %c1_30], %27 {strides = array<i32>} : memref<50x256xf32, #tpu.memory_space<vmem>>, vector<1x48xf32>,
    %c0_31 = arith.constant 0 : index
    %c384 = arith.constant 384 : index
    %29 = vector.load %arg6[%c0_31, %c384] : memref<1x2304xf32, #tpu.memory_space<vmem>>, vector<1x48xf32>
    %c9 = arith.constant 9 : index
    %c1_32 = arith.constant 1 : index
    %30 = vector.load %arg7[%c9, %c1_32] : memref<50x256xf32, #tpu.memory_space<vmem>>, vector<1x48xf32>
    tpu.vector_store %arg7[%c9, %c1_32], %29 {strides = array<i32>} : memref<50x256xf32, #tpu.memory_space<vmem>>, vector<1x48xf32>,
    %c0_33 = arith.constant 0 : index
    %c432 = arith.constant 432 : index
    %31 = vector.load %arg6[%c0_33, %c432] : memref<1x2304xf32, #tpu.memory_space<vmem>>, vector<1x48xf32>
    %c10 = arith.constant 10 : index
    %c1_34 = arith.constant 1 : index
    %32 = vector.load %arg7[%c10, %c1_34] : memref<50x256xf32, #tpu.memory_space<vmem>>, vector<1x48xf32>
    tpu.vector_store %arg7[%c10, %c1_34], %31 {strides = array<i32>} : memref<50x256xf32, #tpu.memory_space<vmem>>, vector<1x48xf32>,
    %c0_35 = arith.constant 0 : index
    %c480 = arith.constant 480 : index
    %33 = vector.load %arg6[%c0_35, %c480] : memref<1x2304xf32, #tpu.memory_space<vmem>>, vector<1x48xf32>
    %c11 = arith.constant 11 : index
    %c1_36 = arith.constant 1 : index
    %34 = vector.load %arg7[%c11, %c1_36] : memref<50x256xf32, #tpu.memory_space<vmem>>, vector<1x48xf32>
    tpu.vector_store %arg7[%c11, %c1_36], %33 {strides = array<i32>} : memref<50x256xf32, #tpu.memory_space<vmem>>, vector<1x48xf32>,
    %c0_37 = arith.constant 0 : index
    %c528 = arith.constant 528 : index
    %35 = vector.load %arg6[%c0_37, %c528] : memref<1x2304xf32, #tpu.memory_space<vmem>>, vector<1x48xf32>
    %c12 = arith.constant 12 : index
    %c1_38 = arith.constant 1 : index
    %36 = vector.load %arg7[%c12, %c1_38] : memref<50x256xf32, #tpu.memory_space<vmem>>, vector<1x48xf32>
    tpu.vector_store %arg7[%c12, %c1_38], %35 {strides = array<i32>} : memref<50x256xf32, #tpu.memory_space<vmem>>, vector<1x48xf32>,
    %c0_39 = arith.constant 0 : index
    %c576 = arith.constant 576 : index
    %37 = vector.load %arg6[%c0_39, %c576] : memref<1x2304xf32, #tpu.memory_space<vmem>>, vector<1x48xf32>
    %c13 = arith.constant 13 : index
    %c1_40 = arith.constant 1 : index
    %38 = vector.load %arg7[%c13, %c1_40] : memref<50x256xf32, #tpu.memory_space<vmem>>, vector<1x48xf32>
    tpu.vector_store %arg7[%c13, %c1_40], %37 {strides = array<i32>} : memref<50x256xf32, #tpu.memory_space<vmem>>, vector<1x48xf32>,
    %c0_41 = arith.constant 0 : index
    %c624 = arith.constant 624 : index
    %39 = vector.load %arg6[%c0_41, %c624] : memref<1x2304xf32, #tpu.memory_space<vmem>>, vector<1x48xf32>
    %c14 = arith.constant 14 : index
    %c1_42 = arith.constant 1 : index
    %40 = vector.load %arg7[%c14, %c1_42] : memref<50x256xf32, #tpu.memory_space<vmem>>, vector<1x48xf32>
    tpu.vector_store %arg7[%c14, %c1_42], %39 {strides = array<i32>} : memref<50x256xf32, #tpu.memory_space<vmem>>, vector<1x48xf32>,
    %c0_43 = arith.constant 0 : index
    %c672 = arith.constant 672 : index
    %41 = vector.load %arg6[%c0_43, %c672] : memref<1x2304xf32, #tpu.memory_space<vmem>>, vector<1x48xf32>
    %c15 = arith.constant 15 : index
    %c1_44 = arith.constant 1 : index
    %42 = vector.load %arg7[%c15, %c1_44] : memref<50x256xf32, #tpu.memory_space<vmem>>, vector<1x48xf32>
    tpu.vector_store %arg7[%c15, %c1_44], %41 {strides = array<i32>} : memref<50x256xf32, #tpu.memory_space<vmem>>, vector<1x48xf32>,
    %c0_45 = arith.constant 0 : index
    %c720 = arith.constant 720 : index
    %43 = vector.load %arg6[%c0_45, %c720] : memref<1x2304xf32, #tpu.memory_space<vmem>>, vector<1x48xf32>
    %c16 = arith.constant 16 : index
    %c1_46 = arith.constant 1 : index
    %44 = vector.load %arg7[%c16, %c1_46] : memref<50x256xf32, #tpu.memory_space<vmem>>, vector<1x48xf32>
    tpu.vector_store %arg7[%c16, %c1_46], %43 {strides = array<i32>} : memref<50x256xf32, #tpu.memory_space<vmem>>, vector<1x48xf32>,
    %c0_47 = arith.constant 0 : index
    %c768 = arith.constant 768 : index
    %45 = vector.load %arg6[%c0_47, %c768] : memref<1x2304xf32, #tpu.memory_space<vmem>>, vector<1x48xf32>
    %c17 = arith.constant 17 : index
    %c1_48 = arith.constant 1 : index
    %46 = vector.load %arg7[%c17, %c1_48] : memref<50x256xf32, #tpu.memory_space<vmem>>, vector<1x48xf32>
    tpu.vector_store %arg7[%c17, %c1_48], %45 {strides = array<i32>} : memref<50x256xf32, #tpu.memory_space<vmem>>, vector<1x48xf32>,
    %c0_49 = arith.constant 0 : index
    %c816 = arith.constant 816 : index
    %47 = vector.load %arg6[%c0_49, %c816] : memref<1x2304xf32, #tpu.memory_space<vmem>>, vector<1x48xf32>
    %c18 = arith.constant 18 : index
    %c1_50 = arith.constant 1 : index
    %48 = vector.load %arg7[%c18, %c1_50] : memref<50x256xf32, #tpu.memory_space<vmem>>, vector<1x48xf32>
    tpu.vector_store %arg7[%c18, %c1_50], %47 {strides = array<i32>} : memref<50x256xf32, #tpu.memory_space<vmem>>, vector<1x48xf32>,
    %c0_51 = arith.constant 0 : index
    %c864 = arith.constant 864 : index
    %49 = vector.load %arg6[%c0_51, %c864] : memref<1x2304xf32, #tpu.memory_space<vmem>>, vector<1x48xf32>
    %c19 = arith.constant 19 : index
    %c1_52 = arith.constant 1 : index
    %50 = vector.load %arg7[%c19, %c1_52] : memref<50x256xf32, #tpu.memory_space<vmem>>, vector<1x48xf32>
    tpu.vector_store %arg7[%c19, %c1_52], %49 {strides = array<i32>} : memref<50x256xf32, #tpu.memory_space<vmem>>, vector<1x48xf32>,
    %c0_53 = arith.constant 0 : index
    %c912 = arith.constant 912 : index
    %51 = vector.load %arg6[%c0_53, %c912] : memref<1x2304xf32, #tpu.memory_space<vmem>>, vector<1x48xf32>
    %c20 = arith.constant 20 : index
    %c1_54 = arith.constant 1 : index
    %52 = vector.load %arg7[%c20, %c1_54] : memref<50x256xf32, #tpu.memory_space<vmem>>, vector<1x48xf32>
    tpu.vector_store %arg7[%c20, %c1_54], %51 {strides = array<i32>} : memref<50x256xf32, #tpu.memory_space<vmem>>, vector<1x48xf32>,
    %c0_55 = arith.constant 0 : index
    %c960 = arith.constant 960 : index
    %53 = vector.load %arg6[%c0_55, %c960] : memref<1x2304xf32, #tpu.memory_space<vmem>>, vector<1x48xf32>
    %c21 = arith.constant 21 : index
    %c1_56 = arith.constant 1 : index
    %54 = vector.load %arg7[%c21, %c1_56] : memref<50x256xf32, #tpu.memory_space<vmem>>, vector<1x48xf32>
    tpu.vector_store %arg7[%c21, %c1_56], %53 {strides = array<i32>} : memref<50x256xf32, #tpu.memory_space<vmem>>, vector<1x48xf32>,
    %c0_57 = arith.constant 0 : index
    %c1008 = arith.constant 1008 : index
    %55 = vector.load %arg6[%c0_57, %c1008] : memref<1x2304xf32, #tpu.memory_space<vmem>>, vector<1x48xf32>
    %c22 = arith.constant 22 : index
    %c1_58 = arith.constant 1 : index
    %56 = vector.load %arg7[%c22, %c1_58] : memref<50x256xf32, #tpu.memory_space<vmem>>, vector<1x48xf32>
    tpu.vector_store %arg7[%c22, %c1_58], %55 {strides = array<i32>} : memref<50x256xf32, #tpu.memory_space<vmem>>, vector<1x48xf32>,
    %c0_59 = arith.constant 0 : index
    %c1056 = arith.constant 1056 : index
    %57 = vector.load %arg6[%c0_59, %c1056] : memref<1x2304xf32, #tpu.memory_space<vmem>>, vector<1x48xf32>
    %c23 = arith.constant 23 : index
    %c1_60 = arith.constant 1 : index
    %58 = vector.load %arg7[%c23, %c1_60] : memref<50x256xf32, #tpu.memory_space<vmem>>, vector<1x48xf32>
    tpu.vector_store %arg7[%c23, %c1_60], %57 {strides = array<i32>} : memref<50x256xf32, #tpu.memory_space<vmem>>, vector<1x48xf32>,
    %c0_61 = arith.constant 0 : index
    %c1104 = arith.constant 1104 : index
    %59 = vector.load %arg6[%c0_61, %c1104] : memref<1x2304xf32, #tpu.memory_space<vmem>>, vector<1x48xf32>
    %c24 = arith.constant 24 : index
    %c1_62 = arith.constant 1 : index
    %60 = vector.load %arg7[%c24, %c1_62] : memref<50x256xf32, #tpu.memory_space<vmem>>, vector<1x48xf32>
    tpu.vector_store %arg7[%c24, %c1_62], %59 {strides = array<i32>} : memref<50x256xf32, #tpu.memory_space<vmem>>, vector<1x48xf32>,
    %c0_63 = arith.constant 0 : index
    %c1152 = arith.constant 1152 : index
    %61 = vector.load %arg6[%c0_63, %c1152] : memref<1x2304xf32, #tpu.memory_space<vmem>>, vector<1x48xf32>
    %c25 = arith.constant 25 : index
    %c1_64 = arith.constant 1 : index
    %62 = vector.load %arg7[%c25, %c1_64] : memref<50x256xf32, #tpu.memory_space<vmem>>, vector<1x48xf32>
    tpu.vector_store %arg7[%c25, %c1_64], %61 {strides = array<i32>} : memref<50x256xf32, #tpu.memory_space<vmem>>, vector<1x48xf32>,
    %c0_65 = arith.constant 0 : index
    %c1200 = arith.constant 1200 : index
    %63 = vector.load %arg6[%c0_65, %c1200] : memref<1x2304xf32, #tpu.memory_space<vmem>>, vector<1x48xf32>
    %c26 = arith.constant 26 : index
    %c1_66 = arith.constant 1 : index
    %64 = vector.load %arg7[%c26, %c1_66] : memref<50x256xf32, #tpu.memory_space<vmem>>, vector<1x48xf32>
    tpu.vector_store %arg7[%c26, %c1_66], %63 {strides = array<i32>} : memref<50x256xf32, #tpu.memory_space<vmem>>, vector<1x48xf32>,
    %c0_67 = arith.constant 0 : index
    %c1248 = arith.constant 1248 : index
    %65 = vector.load %arg6[%c0_67, %c1248] : memref<1x2304xf32, #tpu.memory_space<vmem>>, vector<1x48xf32>
    %c27 = arith.constant 27 : index
    %c1_68 = arith.constant 1 : index
    %66 = vector.load %arg7[%c27, %c1_68] : memref<50x256xf32, #tpu.memory_space<vmem>>, vector<1x48xf32>
    tpu.vector_store %arg7[%c27, %c1_68], %65 {strides = array<i32>} : memref<50x256xf32, #tpu.memory_space<vmem>>, vector<1x48xf32>,
    %c0_69 = arith.constant 0 : index
    %c1296 = arith.constant 1296 : index
    %67 = vector.load %arg6[%c0_69, %c1296] : memref<1x2304xf32, #tpu.memory_space<vmem>>, vector<1x48xf32>
    %c28 = arith.constant 28 : index
    %c1_70 = arith.constant 1 : index
    %68 = vector.load %arg7[%c28, %c1_70] : memref<50x256xf32, #tpu.memory_space<vmem>>, vector<1x48xf32>
    tpu.vector_store %arg7[%c28, %c1_70], %67 {strides = array<i32>} : memref<50x256xf32, #tpu.memory_space<vmem>>, vector<1x48xf32>,
    %c0_71 = arith.constant 0 : index
    %c1344 = arith.constant 1344 : index
    %69 = vector.load %arg6[%c0_71, %c1344] : memref<1x2304xf32, #tpu.memory_space<vmem>>, vector<1x48xf32>
    %c29 = arith.constant 29 : index
    %c1_72 = arith.constant 1 : index
    %70 = vector.load %arg7[%c29, %c1_72] : memref<50x256xf32, #tpu.memory_space<vmem>>, vector<1x48xf32>
    tpu.vector_store %arg7[%c29, %c1_72], %69 {strides = array<i32>} : memref<50x256xf32, #tpu.memory_space<vmem>>, vector<1x48xf32>,
    %c0_73 = arith.constant 0 : index
    %c1392 = arith.constant 1392 : index
    %71 = vector.load %arg6[%c0_73, %c1392] : memref<1x2304xf32, #tpu.memory_space<vmem>>, vector<1x48xf32>
    %c30 = arith.constant 30 : index
    %c1_74 = arith.constant 1 : index
    %72 = vector.load %arg7[%c30, %c1_74] : memref<50x256xf32, #tpu.memory_space<vmem>>, vector<1x48xf32>
    tpu.vector_store %arg7[%c30, %c1_74], %71 {strides = array<i32>} : memref<50x256xf32, #tpu.memory_space<vmem>>, vector<1x48xf32>,
    %c0_75 = arith.constant 0 : index
    %c1440 = arith.constant 1440 : index
    %73 = vector.load %arg6[%c0_75, %c1440] : memref<1x2304xf32, #tpu.memory_space<vmem>>, vector<1x48xf32>
    %c31 = arith.constant 31 : index
    %c1_76 = arith.constant 1 : index
    %74 = vector.load %arg7[%c31, %c1_76] : memref<50x256xf32, #tpu.memory_space<vmem>>, vector<1x48xf32>
    tpu.vector_store %arg7[%c31, %c1_76], %73 {strides = array<i32>} : memref<50x256xf32, #tpu.memory_space<vmem>>, vector<1x48xf32>,
    %c0_77 = arith.constant 0 : index
    %c1488 = arith.constant 1488 : index
    %75 = vector.load %arg6[%c0_77, %c1488] : memref<1x2304xf32, #tpu.memory_space<vmem>>, vector<1x48xf32>
    %c32 = arith.constant 32 : index
    %c1_78 = arith.constant 1 : index
    %76 = vector.load %arg7[%c32, %c1_78] : memref<50x256xf32, #tpu.memory_space<vmem>>, vector<1x48xf32>
    tpu.vector_store %arg7[%c32, %c1_78], %75 {strides = array<i32>} : memref<50x256xf32, #tpu.memory_space<vmem>>, vector<1x48xf32>,
    %c0_79 = arith.constant 0 : index
    %c1536 = arith.constant 1536 : index
    %77 = vector.load %arg6[%c0_79, %c1536] : memref<1x2304xf32, #tpu.memory_space<vmem>>, vector<1x48xf32>
    %c33 = arith.constant 33 : index
    %c1_80 = arith.constant 1 : index
    %78 = vector.load %arg7[%c33, %c1_80] : memref<50x256xf32, #tpu.memory_space<vmem>>, vector<1x48xf32>
    tpu.vector_store %arg7[%c33, %c1_80], %77 {strides = array<i32>} : memref<50x256xf32, #tpu.memory_space<vmem>>, vector<1x48xf32>,
    %c0_81 = arith.constant 0 : index
    %c1584 = arith.constant 1584 : index
    %79 = vector.load %arg6[%c0_81, %c1584] : memref<1x2304xf32, #tpu.memory_space<vmem>>, vector<1x48xf32>
    %c34 = arith.constant 34 : index
    %c1_82 = arith.constant 1 : index
    %80 = vector.load %arg7[%c34, %c1_82] : memref<50x256xf32, #tpu.memory_space<vmem>>, vector<1x48xf32>
    tpu.vector_store %arg7[%c34, %c1_82], %79 {strides = array<i32>} : memref<50x256xf32, #tpu.memory_space<vmem>>, vector<1x48xf32>,
    %c0_83 = arith.constant 0 : index
    %c1632 = arith.constant 1632 : index
    %81 = vector.load %arg6[%c0_83, %c1632] : memref<1x2304xf32, #tpu.memory_space<vmem>>, vector<1x48xf32>
    %c35 = arith.constant 35 : index
    %c1_84 = arith.constant 1 : index
    %82 = vector.load %arg7[%c35, %c1_84] : memref<50x256xf32, #tpu.memory_space<vmem>>, vector<1x48xf32>
    tpu.vector_store %arg7[%c35, %c1_84], %81 {strides = array<i32>} : memref<50x256xf32, #tpu.memory_space<vmem>>, vector<1x48xf32>,
    %c0_85 = arith.constant 0 : index
    %c1680 = arith.constant 1680 : index
    %83 = vector.load %arg6[%c0_85, %c1680] : memref<1x2304xf32, #tpu.memory_space<vmem>>, vector<1x48xf32>
    %c36 = arith.constant 36 : index
    %c1_86 = arith.constant 1 : index
    %84 = vector.load %arg7[%c36, %c1_86] : memref<50x256xf32, #tpu.memory_space<vmem>>, vector<1x48xf32>
    tpu.vector_store %arg7[%c36, %c1_86], %83 {strides = array<i32>} : memref<50x256xf32, #tpu.memory_space<vmem>>, vector<1x48xf32>,
    %c0_87 = arith.constant 0 : index
    %c1728 = arith.constant 1728 : index
    %85 = vector.load %arg6[%c0_87, %c1728] : memref<1x2304xf32, #tpu.memory_space<vmem>>, vector<1x48xf32>
    %c37 = arith.constant 37 : index
    %c1_88 = arith.constant 1 : index
    %86 = vector.load %arg7[%c37, %c1_88] : memref<50x256xf32, #tpu.memory_space<vmem>>, vector<1x48xf32>
    tpu.vector_store %arg7[%c37, %c1_88], %85 {strides = array<i32>} : memref<50x256xf32, #tpu.memory_space<vmem>>, vector<1x48xf32>,
    %c0_89 = arith.constant 0 : index
    %c1776 = arith.constant 1776 : index
    %87 = vector.load %arg6[%c0_89, %c1776] : memref<1x2304xf32, #tpu.memory_space<vmem>>, vector<1x48xf32>
    %c38 = arith.constant 38 : index
    %c1_90 = arith.constant 1 : index
    %88 = vector.load %arg7[%c38, %c1_90] : memref<50x256xf32, #tpu.memory_space<vmem>>, vector<1x48xf32>
    tpu.vector_store %arg7[%c38, %c1_90], %87 {strides = array<i32>} : memref<50x256xf32, #tpu.memory_space<vmem>>, vector<1x48xf32>,
    %c0_91 = arith.constant 0 : index
    %c1824 = arith.constant 1824 : index
    %89 = vector.load %arg6[%c0_91, %c1824] : memref<1x2304xf32, #tpu.memory_space<vmem>>, vector<1x48xf32>
    %c39 = arith.constant 39 : index
    %c1_92 = arith.constant 1 : index
    %90 = vector.load %arg7[%c39, %c1_92] : memref<50x256xf32, #tpu.memory_space<vmem>>, vector<1x48xf32>
    tpu.vector_store %arg7[%c39, %c1_92], %89 {strides = array<i32>} : memref<50x256xf32, #tpu.memory_space<vmem>>, vector<1x48xf32>,
    %c0_93 = arith.constant 0 : index
    %c1872 = arith.constant 1872 : index
    %91 = vector.load %arg6[%c0_93, %c1872] : memref<1x2304xf32, #tpu.memory_space<vmem>>, vector<1x48xf32>
    %c40 = arith.constant 40 : index
    %c1_94 = arith.constant 1 : index
    %92 = vector.load %arg7[%c40, %c1_94] : memref<50x256xf32, #tpu.memory_space<vmem>>, vector<1x48xf32>
    tpu.vector_store %arg7[%c40, %c1_94], %91 {strides = array<i32>} : memref<50x256xf32, #tpu.memory_space<vmem>>, vector<1x48xf32>,
    %c0_95 = arith.constant 0 : index
    %c1920 = arith.constant 1920 : index
    %93 = vector.load %arg6[%c0_95, %c1920] : memref<1x2304xf32, #tpu.memory_space<vmem>>, vector<1x48xf32>
    %c41 = arith.constant 41 : index
    %c1_96 = arith.constant 1 : index
    %94 = vector.load %arg7[%c41, %c1_96] : memref<50x256xf32, #tpu.memory_space<vmem>>, vector<1x48xf32>
    tpu.vector_store %arg7[%c41, %c1_96], %93 {strides = array<i32>} : memref<50x256xf32, #tpu.memory_space<vmem>>, vector<1x48xf32>,
    %c0_97 = arith.constant 0 : index
    %c1968 = arith.constant 1968 : index
    %95 = vector.load %arg6[%c0_97, %c1968] : memref<1x2304xf32, #tpu.memory_space<vmem>>, vector<1x48xf32>
    %c42 = arith.constant 42 : index
    %c1_98 = arith.constant 1 : index
    %96 = vector.load %arg7[%c42, %c1_98] : memref<50x256xf32, #tpu.memory_space<vmem>>, vector<1x48xf32>
    tpu.vector_store %arg7[%c42, %c1_98], %95 {strides = array<i32>} : memref<50x256xf32, #tpu.memory_space<vmem>>, vector<1x48xf32>,
    %c0_99 = arith.constant 0 : index
    %c2016 = arith.constant 2016 : index
    %97 = vector.load %arg6[%c0_99, %c2016] : memref<1x2304xf32, #tpu.memory_space<vmem>>, vector<1x48xf32>
    %c43 = arith.constant 43 : index
    %c1_100 = arith.constant 1 : index
    %98 = vector.load %arg7[%c43, %c1_100] : memref<50x256xf32, #tpu.memory_space<vmem>>, vector<1x48xf32>
    tpu.vector_store %arg7[%c43, %c1_100], %97 {strides = array<i32>} : memref<50x256xf32, #tpu.memory_space<vmem>>, vector<1x48xf32>,
    %c0_101 = arith.constant 0 : index
    %c2064 = arith.constant 2064 : index
    %99 = vector.load %arg6[%c0_101, %c2064] : memref<1x2304xf32, #tpu.memory_space<vmem>>, vector<1x48xf32>
    %c44 = arith.constant 44 : index
    %c1_102 = arith.constant 1 : index
    %100 = vector.load %arg7[%c44, %c1_102] : memref<50x256xf32, #tpu.memory_space<vmem>>, vector<1x48xf32>
    tpu.vector_store %arg7[%c44, %c1_102], %99 {strides = array<i32>} : memref<50x256xf32, #tpu.memory_space<vmem>>, vector<1x48xf32>,
    %c0_103 = arith.constant 0 : index
    %c2112 = arith.constant 2112 : index
    %101 = vector.load %arg6[%c0_103, %c2112] : memref<1x2304xf32, #tpu.memory_space<vmem>>, vector<1x48xf32>
    %c45 = arith.constant 45 : index
    %c1_104 = arith.constant 1 : index
    %102 = vector.load %arg7[%c45, %c1_104] : memref<50x256xf32, #tpu.memory_space<vmem>>, vector<1x48xf32>
    tpu.vector_store %arg7[%c45, %c1_104], %101 {strides = array<i32>} : memref<50x256xf32, #tpu.memory_space<vmem>>, vector<1x48xf32>,
    %c0_105 = arith.constant 0 : index
    %c2160 = arith.constant 2160 : index
    %103 = vector.load %arg6[%c0_105, %c2160] : memref<1x2304xf32, #tpu.memory_space<vmem>>, vector<1x48xf32>
    %c46 = arith.constant 46 : index
    %c1_106 = arith.constant 1 : index
    %104 = vector.load %arg7[%c46, %c1_106] : memref<50x256xf32, #tpu.memory_space<vmem>>, vector<1x48xf32>
    tpu.vector_store %arg7[%c46, %c1_106], %103 {strides = array<i32>} : memref<50x256xf32, #tpu.memory_space<vmem>>, vector<1x48xf32>,
    %c0_107 = arith.constant 0 : index
    %c2208 = arith.constant 2208 : index
    %105 = vector.load %arg6[%c0_107, %c2208] : memref<1x2304xf32, #tpu.memory_space<vmem>>, vector<1x48xf32>
    %c47 = arith.constant 47 : index
    %c1_108 = arith.constant 1 : index
    %106 = vector.load %arg7[%c47, %c1_108] : memref<50x256xf32, #tpu.memory_space<vmem>>, vector<1x48xf32>
    tpu.vector_store %arg7[%c47, %c1_108], %105 {strides = array<i32>} : memref<50x256xf32, #tpu.memory_space<vmem>>, vector<1x48xf32>,
    %c0_109 = arith.constant 0 : index
    %c2256 = arith.constant 2256 : index
    %107 = vector.load %arg6[%c0_109, %c2256] : memref<1x2304xf32, #tpu.memory_space<vmem>>, vector<1x48xf32>
    %c48_110 = arith.constant 48 : index
    %c1_111 = arith.constant 1 : index
    %108 = vector.load %arg7[%c48_110, %c1_111] : memref<50x256xf32, #tpu.memory_space<vmem>>, vector<1x48xf32>
    tpu.vector_store %arg7[%c48_110, %c1_111], %107 {strides = array<i32>} : memref<50x256xf32, #tpu.memory_space<vmem>>, vector<1x48xf32>,
    %c1_112 = arith.constant 1 : index
    %109 = memref.load %arg4[%c1_112] : memref<6xf32, #tpu.memory_space<smem>>
    %c2_113 = arith.constant 2 : index
    %110 = memref.load %arg4[%c2_113] : memref<6xf32, #tpu.memory_space<smem>>
    %c3_114 = arith.constant 3 : index
    %111 = memref.load %arg4[%c3_114] : memref<6xf32, #tpu.memory_space<smem>>
    %c4_115 = arith.constant 4 : index
    %112 = memref.load %arg4[%c4_115] : memref<6xf32, #tpu.memory_space<smem>>
    %c5_116 = arith.constant 5 : index
    %113 = memref.load %arg4[%c5_116] : memref<6xf32, #tpu.memory_space<smem>>
    %c0_117 = arith.constant 0 : index
    %c0_118 = arith.constant 0 : index
    %114 = vector.load %arg7[%c0_117, %c0_118] : memref<50x256xf32, #tpu.memory_space<vmem>>, vector<49x128xf32>
    %115 = vector.broadcast %109 : f32 to vector<49x128xf32>
    %116 = arith.mulf %115, %114 : vector<49x128xf32>
    %c0_119 = arith.constant 0 : index
    %c1_120 = arith.constant 1 : index
    %117 = vector.load %arg7[%c0_119, %c1_120] : memref<50x256xf32, #tpu.memory_space<vmem>>, vector<49x128xf32>
    %118 = vector.broadcast %110 : f32 to vector<49x128xf32>
    %119 = arith.mulf %118, %117 : vector<49x128xf32>
    %120 = arith.addf %116, %119 : vector<49x128xf32>
    %c1_121 = arith.constant 1 : index
    %c0_122 = arith.constant 0 : index
    %121 = vector.load %arg7[%c1_121, %c0_122] : memref<50x256xf32, #tpu.memory_space<vmem>>, vector<49x128xf32>
    %122 = vector.broadcast %111 : f32 to vector<49x128xf32>
    %123 = arith.mulf %122, %121 : vector<49x128xf32>
    %124 = arith.addf %120, %123 : vector<49x128xf32>
    %c1_123 = arith.constant 1 : index
    %c1_124 = arith.constant 1 : index
    %125 = vector.load %arg7[%c1_123, %c1_124] : memref<50x256xf32, #tpu.memory_space<vmem>>, vector<49x128xf32>
    %126 = vector.broadcast %112 : f32 to vector<49x128xf32>
    %127 = arith.mulf %126, %125 : vector<49x128xf32>
    %128 = arith.addf %124, %127 : vector<49x128xf32>
    %129 = vector.broadcast %113 : f32 to vector<49x128xf32>
    %130 = arith.addf %128, %129 : vector<49x128xf32>
    %c0_125 = arith.constant 0 : index
    %c0_126 = arith.constant 0 : index
    %131 = vector.load %arg5[%c0_125, %c0_126] : memref<49x128xf32, #tpu.memory_space<vmem>>, vector<49x128xf32>
    tpu.vector_store %arg5[%c0_125, %c0_126], %130 {strides = array<i32>} : memref<49x128xf32, #tpu.memory_space<vmem>>, vector<49x128xf32>,
    return
  }
}

</mosaic_0001>

<bundles_post_ra>
// kernel: net_forward.1
= control target key start
LH: loop header
LB: loop body
LE: loop exit
PB: predicated region body
PF: predicated region fallthrough
CT: control target
= control target key end

     0   :  { %10 = vsyncpa [#allocation5], 0  ;;  %s1902_s0 = inlined_call_operand.vmem [shape: f32[9,48], index: 0, kind: input, shape index: {}]   ;;  %s1903_s1 = inlined_call_operand.vmem [shape: f32[1,9], index: 1, kind: input, shape index: {}]   ;;  %s1904_s2 = inlined_call_operand.hbm [shape: f32[48,2304], index: 2, kind: input, shape index: {}]   ;;  %s1905_s3 = inlined_call_operand.vmem [shape: f32[1,2304], index: 3, kind: input, shape index: {}]   ;;  %s1906_s4 = inlined_call_operand.vmem [shape: f32[6], index: 4, kind: input, shape index: {}]   ;;  %s1907_s5 = inlined_call_operand.vmem [shape: f32[49,128], index: 5, kind: output, shape index: {}]  }
   0x1   :  { %s20_s20 = sshll.u32 %s1904_s2, 4  ;;  %s21_s20 = int_to_ptr.hbm [resolvable:$true] %s20_s20 }
   0x2   :  { %11 = vsyncpa [#allocation6], 0  ;;  %s1454_s21 = smov [#allocation4]   ;;  %s36_s25 = sshll.u32 %s1906_s4, 4  ;;  %s37_s25 = int_to_ptr.vmem [resolvable:$true] %s36_s25 }
   0x3   :  { %s22_s22 = sshll.u32 %s1454_s21, 4  ;;  %s1455_s26 = smov 2304   ;;  %s23_s22 = int_to_ptr.vmem [resolvable:$true] %s22_s22 }
   0x4   :  { %s1456_s27 = smov 144   ;;  %s1457_s28 = smov [#allocation7]  }
   0x5   :  { %28 = dma.hbm_to_vmem [thread:$0]  %s21_s20, 13824, %s23_s22, [#allocation5], %s1455_s26, %s1455_s26, %s1456_s27  }
   0x6   :  { %39 = dma.vmem_to_smem %s37_s25, 16, %s1457_s28, [#allocation6]  }
   0x7   :  { %1450 = dma.done.wait [#allocation5], 13824  }
   0x8   :  { %1451 = vsyncadd [#allocation5], 4294953472 }
   0x9   :  { %1452 = dma.done.wait [#allocation6], 16  }
   0xa   :  { %1453 = vsyncadd [#allocation6], 4294967280 }
   0xb   :  { %48 = sfence }
   0xc   :  { %v51_v0 = vld [vmem:[%s1902_s0 + $0x8] sm:$0x1]  ;;  %vm58_vm0 = vcmask 1040384   ;;  %v50_v1 = vld [vmem:[%s1902_s0] sm:$0xff]  ;;  %vm54_vm1 = vcmask 72704   ;;  %v172_v3 = vld [vmem:[#allocation4 + $0x2d0] sm:$0xff] }
   0xd   :  { %v49_v2 = vld [vmem:[%s1903_s1] sm:$0x1]  ;;  %1339 = vmatpush.msk.msra.mxu0 %vm58_vm0, %v51_v0  ;;  %v154_v5 = vld [vmem:[#allocation4 + $0x240] sm:$0xff]  ;;  %246 = vmatpush.msra.mxu1 %v172_v3  ;;  %v155_v6 = vld [vmem:[#allocation4 + $0x248] sm:$0xff]  ;;  %s52_s0 = sld [smem:[#allocation7]]  ;;  %vm232_vm2 = vcmask 392192  }
   0xe   :  { %v173_v4 = vld [vmem:[#allocation4 + $0x2d8] sm:$0xff]  ;;  %v174_v7 = vld [vmem:[#allocation4 + $0x2e0] sm:$0xff]  ;;  %v175_v8 = vld [vmem:[#allocation4 + $0x2e8] sm:$0xff]  ;;  %s1360_s1 = sld [smem:[#allocation7 + $0x2]]  ;;  %s1459_s8 = smov 127   ;;  %vm630_vm3 = vcmask 1042434  }
   0xf   :  { %266 = vmatpush.msra.mxu2 %v173_v4  ;;  %77 = vmatpush.msra.mxu0 %v50_v1  ;;  %v136_v9 = vld [vmem:[#allocation4 + $0x1b0] sm:$0xff]  ;;  %v137_v11 = vld [vmem:[#allocation4 + $0x1b8] sm:$0xff]  ;;  %v118_v13 = vld [vmem:[#allocation4 + $0x120] sm:$0xff]  ;;  %vm632_vm4 = vcmask 1041408   ;;  %vm634_vm5 = vcmask 1044484   ;;  %vm636_vm6 = vcmask 1046534  }
  0x10   :  { %286 = vmatpush.msra.mxu3 %v174_v7  ;;  %v156_v10 = vld [vmem:[#allocation4 + $0x250] sm:$0xff]  ;;  %1340 = vmatmul.msk.f32.vlgmr.msra.gmra.mxu0 %vm54_vm1, %v49_v2  ;;  %v157_v12 = vld [vmem:[#allocation4 + $0x258] sm:$0xff]  ;;  %v138_v14 = vld [vmem:[#allocation4 + $0x1c0] sm:$0xff]  ;;  %vm638_vm7 = vcmask 1045508   ;;  %vm640_vm8 = vcmask 1043456   ;;  %s1460_s13 = smov 113  }
  0x11   :  { %247 = vmatpush.msra.mxu1 %v154_v5  ;;  %267 = vmatpush.msra.mxu2 %v155_v6  ;;  %v119_v15 = vld [vmem:[#allocation4 + $0x128] sm:$0xff]  ;;  %v100_v17 = vld [vmem:[#allocation4 + $0x90] sm:$0xff]  ;;  %v101_v19 = vld [vmem:[#allocation4 + $0x98] sm:$0xff]  ;;  %s1461_s14 = smov 1   ;;  %s1462_s15 = smov 33   ;;  %vm680_vm10 = vcmask 393224  }
  0x12   :  { %306 = vmatpush.msrb.mxu0 %v175_v8  ;;  %287 = vmatpush.msra.mxu3 %v156_v10  ;;  %v139_v16 = vld [vmem:[#allocation4 + $0x1c8] sm:$0xff]  ;;  %v120_v18 = vld [vmem:[#allocation4 + $0x130] sm:$0xff]  ;;  %v121_v20 = vld [vmem:[#allocation4 + $0x138] sm:$0xff]  ;;  %s1463_s16 = smov 65   ;;  %s1464_s17 = smov 81   ;;  %vm697_vm11 = vcmask 269312  }
  0x13   :  { %248 = vmatpush.msra.mxu1 %v136_v9  ;;  %268 = vmatpush.msra.mxu2 %v137_v11  ;;  %v82_v21 = vld [vmem:[#allocation4] sm:$0xff]  ;;  %v83_v23 = vld [vmem:[#allocation4 + $0x8] sm:$0xff]  ;;  %v176_v25 = vld [vmem:[#allocation4 + $0x2f0] sm:$0xff]  ;;  %v53_v51 = vstv %s52_s0  ;;  %s1465_s20 = smov 97   ;;  %s1467_s21 = smov 49   ;;  %vm723_vm12 = vcmask 138240  }
  0x14   :  { %307 = vmatpush.msrb.mxu0 %v157_v12  ;;  %288 = vmatpush.msra.mxu3 %v138_v14  ;;  %v102_v22 = vld [vmem:[#allocation4 + $0xa0] sm:$0xff]  ;;  %v103_v24 = vld [vmem:[#allocation4 + $0xa8] sm:$0xff]  ;;  %v177_v26 = vld [vmem:[#allocation4 + $0x2f8] sm:$0xff]  ;;  %s1362_s22 = sld [smem:[#allocation7 + $0x4]]  ;;  %vm1184_vm13 = vcmask 1046528   ;;  %vm1145_vm14 = vcmask 1039360  }
  0x15   :  { %249 = vmatpush.msra.mxu1 %v118_v13  ;;  %269 = vmatpush.msra.mxu2 %v119_v15  ;;  %v84_v27 = vld [vmem:[#allocation4 + $0x10] sm:$0xff]  ;;  %v85_v28 = vld [vmem:[#allocation4 + $0x18] sm:$0xff]  ;;  %v158_v29 = vld [vmem:[#allocation4 + $0x260] sm:$0xff]  ;;  %s1361_s23 = sld [smem:[#allocation7 + $0x3]] }
  0x16   :  { %308 = vmatpush.msrb.mxu0 %v139_v16  ;;  %289 = vmatpush.msra.mxu3 %v120_v18  ;;  %v159_v30 = vld [vmem:[#allocation4 + $0x268] sm:$0xff]  ;;  %v178_v31 = vld [vmem:[#allocation4 + $0x300] sm:$0xff]  ;;  %v140_v33 = vld [vmem:[#allocation4 + $0x1d0] sm:$0xff]  ;;  %s1359_s24 = sld [smem:[#allocation7 + $0x1]] }
  0x17   :  { %250 = vmatpush.msra.mxu1 %v100_v17  ;;  %270 = vmatpush.msra.mxu2 %v101_v19  ;;  %v179_v32 = vld [vmem:[#allocation4 + $0x308] sm:$0xff]  ;;  %v141_v34 = vld [vmem:[#allocation4 + $0x1d8] sm:$0xff]  ;;  %v160_v35 = vld [vmem:[#allocation4 + $0x270] sm:$0xff]  ;;  %s1363_s25 = sld [smem:[#allocation7 + $0x5]] }
  0x18   :  { %309 = vmatpush.msrb.mxu0 %v121_v20  ;;  %290 = vmatpush.msra.mxu3 %v102_v22  ;;  %v161_v36 = vld [vmem:[#allocation4 + $0x278] sm:$0xff]  ;;  %v122_v37 = vld [vmem:[#allocation4 + $0x140] sm:$0xff]  ;;  %v123_v38 = vld [vmem:[#allocation4 + $0x148] sm:$0xff] }
  0x19   :  { %251 = vmatpush.msra.mxu1 %v82_v21  ;;  %271 = vmatpush.msra.mxu2 %v83_v23  ;;  %v142_v39 = vld [vmem:[#allocation4 + $0x1e0] sm:$0xff]  ;;  %v143_v40 = vld [vmem:[#allocation4 + $0x1e8] sm:$0xff]  ;;  %v104_v41 = vld [vmem:[#allocation4 + $0xb0] sm:$0xff] }
  0x1a   :  { %310 = vmatpush.msrb.mxu0 %v103_v24  ;;  %291 = vmatpush.msra.mxu3 %v84_v27  ;;  %v105_v42 = vld [vmem:[#allocation4 + $0xb8] sm:$0xff]  ;;  %v124_v43 = vld [vmem:[#allocation4 + $0x150] sm:$0xff]  ;;  %v86_v45 = vld [vmem:[#allocation4 + $0x20] sm:$0xff] }
  0x1b   :  { %326 = vmatpush.msrb.mxu1 %v176_v25  ;;  %346 = vmatpush.msrb.mxu2 %v177_v26  ;;  %v125_v44 = vld [vmem:[#allocation4 + $0x158] sm:$0xff]  ;;  %v87_v46 = vld [vmem:[#allocation4 + $0x28] sm:$0xff]  ;;  %v106_v47 = vld [vmem:[#allocation4 + $0xc0] sm:$0xff] }
  0x1c   :  { %311 = vmatpush.msrb.mxu0 %v85_v28  ;;  %366 = vmatpush.msrb.mxu3 %v178_v31  ;;  %v107_v48 = vld [vmem:[#allocation4 + $0xc8] sm:$0xff]  ;;  %v88_v49 = vld [vmem:[#allocation4 + $0x30] sm:$0xff]  ;;  %v89_v50 = vld [vmem:[#allocation4 + $0x38] sm:$0xff] }
  0x1d   :  { %327 = vmatpush.msrb.mxu1 %v158_v29  ;;  %347 = vmatpush.msrb.mxu2 %v159_v30  ;;  %v180_v54 = vld [vmem:[#allocation4 + $0x310] sm:$0xff]  ;;  %v181_v55 = vld [vmem:[#allocation4 + $0x318] sm:$0xff]  ;;  %v182_v56 = vld [vmem:[#allocation4 + $0x320] sm:$0xff] }
  0x1e   :  { %386 = vmatpush.msra.mxu0 %v179_v32  ;;  %367 = vmatpush.msrb.mxu3 %v160_v35  ;;  %v183_v57 = vld [vmem:[#allocation4 + $0x328] sm:$0xff]  ;;  %v162_v58 = vld [vmem:[#allocation4 + $0x280] sm:$0xff]  ;;  %v164_v60 = vld [vmem:[#allocation4 + $0x290] sm:$0xff] }
  0x1f   :  { %328 = vmatpush.msrb.mxu1 %v140_v33  ;;  %348 = vmatpush.msrb.mxu2 %v141_v34  ;;  %v163_v59 = vld [vmem:[#allocation4 + $0x288] sm:$0xff]  ;;  %v165_v61 = vld [vmem:[#allocation4 + $0x298] sm:$0xff]  ;;  %v144_v62 = vld [vmem:[#allocation4 + $0x1f0] sm:$0xff] }
  0x20   :  { %387 = vmatpush.msra.mxu0 %v161_v36  ;;  %368 = vmatpush.msrb.mxu3 %v142_v39  ;;  %v145_v63 = vld [vmem:[#allocation4 + $0x1f8] sm:$0xff]  ;;  %v146_v0 = vld [vmem:[#allocation4 + $0x200] sm:$0xff]  ;;  %v147_v1 = vld [vmem:[#allocation4 + $0x208] sm:$0xff] }
  0x21   :  { %329 = vmatpush.msrb.mxu1 %v122_v37  ;;  %349 = vmatpush.msrb.mxu2 %v123_v38  ;;  %v126_v2 = vld [vmem:[#allocation4 + $0x160] sm:$0xff]  ;;  %v127_v3 = vld [vmem:[#allocation4 + $0x168] sm:$0xff]  ;;  %v108_v4 = vld [vmem:[#allocation4 + $0xd0] sm:$0xff] }
  0x22   :  { %388 = vmatpush.msra.mxu0 %v143_v40  ;;  %369 = vmatpush.msrb.mxu3 %v124_v43  ;;  %v109_v5 = vld [vmem:[#allocation4 + $0xd8] sm:$0xff]  ;;  %v128_v6 = vld [vmem:[#allocation4 + $0x170] sm:$0xff]  ;;  %v90_v8 = vld [vmem:[#allocation4 + $0x40] sm:$0xff] }
  0x23   :  { %330 = vmatpush.msrb.mxu1 %v104_v41  ;;  %350 = vmatpush.msrb.mxu2 %v105_v42  ;;  %v129_v7 = vld [vmem:[#allocation4 + $0x178] sm:$0xff]  ;;  %v91_v9 = vld [vmem:[#allocation4 + $0x48] sm:$0xff]  ;;  %v110_v10 = vld [vmem:[#allocation4 + $0xe0] sm:$0xff] }
  0x24   :  { %389 = vmatpush.msra.mxu0 %v125_v44  ;;  %370 = vmatpush.msrb.mxu3 %v106_v47  ;;  %v111_v11 = vld [vmem:[#allocation4 + $0xe8] sm:$0xff]  ;;  %v184_v12 = vld [vmem:[#allocation4 + $0x330] sm:$0xff]  ;;  %v185_v13 = vld [vmem:[#allocation4 + $0x338] sm:$0xff] }
  0x25   :  { %331 = vmatpush.msrb.mxu1 %v86_v45  ;;  %351 = vmatpush.msrb.mxu2 %v87_v46  ;;  %v92_v14 = vld [vmem:[#allocation4 + $0x50] sm:$0xff]  ;;  %v93_v15 = vld [vmem:[#allocation4 + $0x58] sm:$0xff]  ;;  %v166_v16 = vld [vmem:[#allocation4 + $0x2a0] sm:$0xff] }
  0x26   :  { %390 = vmatpush.msra.mxu0 %v107_v48  ;;  %371 = vmatpush.msrb.mxu3 %v88_v49  ;;  %v167_v17 = vld [vmem:[#allocation4 + $0x2a8] sm:$0xff]  ;;  %v186_v18 = vld [vmem:[#allocation4 + $0x340] sm:$0xff]  ;;  %v148_v20 = vld [vmem:[#allocation4 + $0x210] sm:$0xff] }
  0x27   :  { %v187_v19 = vld [vmem:[#allocation4 + $0x348] sm:$0xff]  ;;  %v149_v21 = vld [vmem:[#allocation4 + $0x218] sm:$0xff]  ;;  %v168_v22 = vld [vmem:[#allocation4 + $0x2b0] sm:$0xff] }
  0x28   :  { %391 = vmatpush.msra.mxu0 %v89_v50  ;;  %v169_v23 = vld [vmem:[#allocation4 + $0x2b8] sm:$0xff]  ;;  %v130_v24 = vld [vmem:[#allocation4 + $0x180] sm:$0xff]  ;;  %v131_v25 = vld [vmem:[#allocation4 + $0x188] sm:$0xff]  ;;  %v1552_v50 = vstv %s1360_s1 }
  0x29   :  { %v150_v26 = vld [vmem:[#allocation4 + $0x220] sm:$0xff]  ;;  %v151_v27 = vld [vmem:[#allocation4 + $0x228] sm:$0xff]  ;;  %v112_v28 = vld [vmem:[#allocation4 + $0xf0] sm:$0xff] }
  0x2a   :  { %v113_v29 = vld [vmem:[#allocation4 + $0xf8] sm:$0xff]  ;;  %v132_v30 = vld [vmem:[#allocation4 + $0x190] sm:$0xff]  ;;  %v94_v32 = vld [vmem:[#allocation4 + $0x60] sm:$0xff] }
  0x2b   :  { %v133_v31 = vld [vmem:[#allocation4 + $0x198] sm:$0xff]  ;;  %v95_v33 = vld [vmem:[#allocation4 + $0x68] sm:$0xff]  ;;  %v114_v34 = vld [vmem:[#allocation4 + $0x100] sm:$0xff] }
  0x2c   :  { %v115_v35 = vld [vmem:[#allocation4 + $0x108] sm:$0xff]  ;;  %v188_v36 = vld [vmem:[#allocation4 + $0x350] sm:$0xff]  ;;  %v189_v37 = vld [vmem:[#allocation4 + $0x358] sm:$0xff] }
  0x2d   :  { %v96_v38 = vld [vmem:[#allocation4 + $0x70] sm:$0xff]  ;;  %v97_v39 = vld [vmem:[#allocation4 + $0x78] sm:$0xff]  ;;  %v170_v40 = vld [vmem:[#allocation4 + $0x2c0] sm:$0xff] }
  0x2e   :  { %v171_v41 = vld [vmem:[#allocation4 + $0x2c8] sm:$0xff]  ;;  %v152_v42 = vld [vmem:[#allocation4 + $0x230] sm:$0xff]  ;;  %v153_v43 = vld [vmem:[#allocation4 + $0x238] sm:$0xff] }
  0x2f   :  { %v134_v44 = vld [vmem:[#allocation4 + $0x1a0] sm:$0xff]  ;;  %v135_v45 = vld [vmem:[#allocation4 + $0x1a8] sm:$0xff]  ;;  %v116_v46 = vld [vmem:[#allocation4 + $0x110] sm:$0xff] }
  0x30   :  { %v117_v47 = vld [vmem:[#allocation4 + $0x118] sm:$0xff]  ;;  %v98_v48 = vld [vmem:[#allocation4 + $0x80] sm:$0xff]  ;;  %v99_v49 = vld [vmem:[#allocation4 + $0x88] sm:$0xff] }
  0x8d   :  { %v79_v52 = vpop.f32.mrf.mxu0 }
  0x8e   :  { %v1514_v53 = vadd.f32 %v79_v52, %v53_v51  ;;  %v1094_v51 = vmul.f32 0.0, %v1552_v50  ;;  %v1458_v52 = vmov 0.0  }
  0x8f   :  { %660 = vst [vmem:[#allocation3] sm:$0xff] %v1458_v52 }
  0x90   :  { %1341 = vmatmul.msk.f32.vlgmr.msra.gmra.mxu1 %vm232_vm2, %v1514_v53  ;;  %1342 = vmatmul.msk.f32.vlgmr.msra.gmra.mxu2 %vm232_vm2, %v1514_v53  ;;  %661 = vst [vmem:[#allocation3 + $0x8] sm:$0xff] %v1458_v52 }
  0x91   :  { %1343 = vmatmul.msk.f32.vlgmr.msra.gmra.mxu3 %vm232_vm2, %v1514_v53  ;;  %1344 = vmatmul.msk.f32.vlgmr.msrb.gmra.mxu0 %vm232_vm2, %v1514_v53  ;;  %662 = vst [vmem:[#allocation3 + $0x10] sm:$0xff] %v1458_v52 }
  0x92   :  { %406 = vmatpush.msra.mxu1 %v180_v54  ;;  %426 = vmatpush.msra.mxu2 %v181_v55  ;;  %664 = vst [vmem:[#allocation3 + $0x20] sm:$0xff] %v1458_v52  ;;  %v190_v55 = vld [vmem:[%s1905_s3] sm:$0xff] }
  0x93   :  { %446 = vmatpush.msra.mxu3 %v182_v56  ;;  %466 = vmatpush.msrb.mxu0 %v183_v57  ;;  %666 = vst [vmem:[#allocation3 + $0x30] sm:$0xff] %v1458_v52  ;;  %v197_v57 = vperm.slane %v190_v55, 1 }
  0x94   :  { %407 = vmatpush.msra.mxu1 %v162_v58  ;;  %427 = vmatpush.msra.mxu2 %v163_v59  ;;  %668 = vst [vmem:[#allocation3 + $0x40] sm:$0xff] %v1458_v52  ;;  %v198_v58 = vperm.slane %v190_v55, 2 }
  0x95   :  { %447 = vmatpush.msra.mxu3 %v164_v60  ;;  %467 = vmatpush.msrb.mxu0 %v165_v61  ;;  %670 = vst [vmem:[#allocation3 + $0x50] sm:$0xff] %v1458_v52  ;;  %v199_v60 = vperm.slane %v190_v55, 3  ;;  %v200_v61 = vperm.slane %v190_v55, 4 }
  0x96   :  { %408 = vmatpush.msra.mxu1 %v144_v62  ;;  %428 = vmatpush.msra.mxu2 %v145_v63  ;;  %672 = vst [vmem:[#allocation3 + $0x60] sm:$0x3] %v1458_v52 }
  0x97   :  { %448 = vmatpush.msra.mxu3 %v146_v0  ;;  %468 = vmatpush.msrb.mxu0 %v147_v1  ;;  %673 = vst [vmem:[#allocation3 + $0x68] sm:$0x3] %v1458_v52  ;;  %v203_v1 = vperm.slane %v190_v55, 7 }
  0x98   :  { %409 = vmatpush.msra.mxu1 %v126_v2  ;;  %429 = vmatpush.msra.mxu2 %v127_v3  ;;  %v201_v3 = vperm.slane %v190_v55, 5 }
  0x99   :  { %1345 = vmatmul.msk.f32.vlgmr.msrb.gmra.mxu1 %vm232_vm2, %v1514_v53  ;;  %1346 = vmatmul.msk.f32.vlgmr.msrb.gmra.mxu2 %vm232_vm2, %v1514_v53 }
  0x9a   :  { %1347 = vmatmul.msk.f32.vlgmr.msrb.gmra.mxu3 %vm232_vm2, %v1514_v53  ;;  %1348 = vmatmul.msk.f32.vlgmr.msra.gmra.mxu0 %vm232_vm2, %v1514_v53 }
  0x9b   :  { %410 = vmatpush.msra.mxu1 %v108_v4  ;;  %430 = vmatpush.msra.mxu2 %v109_v5  ;;  %v196_v4 = vperm.slane %v190_v55, 0 }
  0x9c   :  { %449 = vmatpush.msra.mxu3 %v128_v6  ;;  %469 = vmatpush.msrb.mxu0 %v129_v7  ;;  %v202_v6 = vperm.slane %v190_v55, 6 }
  0x9d   :  { %411 = vmatpush.msra.mxu1 %v90_v8  ;;  %431 = vmatpush.msra.mxu2 %v91_v9 }
  0x9e   :  { %450 = vmatpush.msra.mxu3 %v110_v10  ;;  %470 = vmatpush.msrb.mxu0 %v111_v11 }
  0x9f   :  { %486 = vmatpush.msrb.mxu1 %v184_v12  ;;  %506 = vmatpush.msrb.mxu2 %v185_v13 }
  0xa0   :  { %451 = vmatpush.msra.mxu3 %v92_v14  ;;  %471 = vmatpush.msrb.mxu0 %v93_v15 }
  0xa1   :  { %487 = vmatpush.msrb.mxu1 %v166_v16  ;;  %507 = vmatpush.msrb.mxu2 %v167_v17 }
  0xa2   :  { %526 = vmatpush.msrb.mxu3 %v186_v18  ;;  %546 = vmatpush.msra.mxu0 %v187_v19 }
  0xa3   :  { %488 = vmatpush.msrb.mxu1 %v148_v20  ;;  %508 = vmatpush.msrb.mxu2 %v149_v21 }
  0xa4   :  { %527 = vmatpush.msrb.mxu3 %v168_v22  ;;  %547 = vmatpush.msra.mxu0 %v169_v23 }
  0xa5   :  { %1349 = vmatmul.msk.f32.vlgmr.msra.gmra.mxu1 %vm232_vm2, %v1514_v53  ;;  %1350 = vmatmul.msk.f32.vlgmr.msra.gmra.mxu2 %vm232_vm2, %v1514_v53 }
  0xa6   :  { %1351 = vmatmul.msk.f32.vlgmr.msra.gmra.mxu3 %vm232_vm2, %v1514_v53  ;;  %1352 = vmatmul.msk.f32.vlgmr.msrb.gmra.mxu0 %vm232_vm2, %v1514_v53 }
  0xa7   :  { %489 = vmatpush.msrb.mxu1 %v130_v24  ;;  %509 = vmatpush.msrb.mxu2 %v131_v25 }
  0xa8   :  { %528 = vmatpush.msrb.mxu3 %v150_v26  ;;  %548 = vmatpush.msra.mxu0 %v151_v27 }
  0xa9   :  { %490 = vmatpush.msrb.mxu1 %v112_v28  ;;  %510 = vmatpush.msrb.mxu2 %v113_v29 }
  0xaa   :  { %529 = vmatpush.msrb.mxu3 %v132_v30  ;;  %549 = vmatpush.msra.mxu0 %v133_v31  ;;  %v191_v30 = vld [vmem:[%s1905_s3 + $0x8] sm:$0xff] }
  0xab   :  { %491 = vmatpush.msrb.mxu1 %v94_v32  ;;  %511 = vmatpush.msrb.mxu2 %v95_v33  ;;  %v205_v32 = vperm.slane %v191_v30, 1 }
  0xac   :  { %530 = vmatpush.msrb.mxu3 %v114_v34  ;;  %550 = vmatpush.msra.mxu0 %v115_v35  ;;  %v206_v34 = vperm.slane %v191_v30, 2  ;;  %v207_v35 = vperm.slane %v191_v30, 3 }
  0xad   :  { %566 = vmatpush.msra.mxu1 %v188_v36  ;;  %586 = vmatpush.msra.mxu2 %v189_v37  ;;  %v208_v36 = vperm.slane %v191_v30, 4 }
  0xae   :  { %531 = vmatpush.msrb.mxu3 %v96_v38  ;;  %551 = vmatpush.msra.mxu0 %v97_v39 }
  0xaf   :  { %1353 = vmatmul.msk.f32.vlgmr.msrb.gmra.mxu1 %vm232_vm2, %v1514_v53  ;;  %1354 = vmatmul.msk.f32.vlgmr.msrb.gmra.mxu2 %vm232_vm2, %v1514_v53 }
  0xb0   :  { %1355 = vmatmul.msk.f32.vlgmr.msrb.gmra.mxu3 %vm232_vm2, %v1514_v53  ;;  %1356 = vmatmul.msk.f32.vlgmr.msra.gmra.mxu0 %vm232_vm2, %v1514_v53 }
  0xb1   :  { %567 = vmatpush.msra.mxu1 %v170_v40  ;;  %587 = vmatpush.msra.mxu2 %v171_v41 }
  0xb2   :  { %1127 = vrot.lane.b32.xlu2 %v1094_v51, %s1459_s8  ;;  %1123 = vrot.lane.b32.xlu0 %v1094_v51, %s1459_s8 }
  0xb3   :  { %568 = vmatpush.msra.mxu1 %v152_v42  ;;  %588 = vmatpush.msra.mxu2 %v153_v43  ;;  %v211_v43 = vperm.slane %v191_v30, 7 }
  0xb4   :  { %1119 = vrot.lane.b32.xlu1 %v1094_v51, %s1459_s8 }
  0xb5   :  { %569 = vmatpush.msra.mxu1 %v134_v44  ;;  %589 = vmatpush.msra.mxu2 %v135_v45  ;;  %v204_v45 = vperm.slane %v191_v30, 0 }
  0xb7   :  { %570 = vmatpush.msra.mxu1 %v116_v46  ;;  %590 = vmatpush.msra.mxu2 %v117_v47  ;;  %v209_v47 = vperm.slane %v191_v30, 5 }
  0xb9   :  { %571 = vmatpush.msra.mxu1 %v98_v48  ;;  %591 = vmatpush.msra.mxu2 %v99_v49  ;;  %v210_v49 = vperm.slane %v191_v30, 6 }
  0xba   :  { %1357 = vmatmul.msk.f32.vlgmr.msra.gmra.mxu1 %vm232_vm2, %v1514_v53  ;;  %1358 = vmatmul.msk.f32.vlgmr.msra.gmra.mxu2 %vm232_vm2, %v1514_v53 }
  0xbb   :  { %1139 = vrot.lane.b32.xlu2 %v1094_v51, %s1459_s8  ;;  %1135 = vrot.lane.b32.xlu0 %v1094_v51, %s1459_s8 }
  0xbc   :  { %1131 = vrot.lane.b32.xlu1 %v1094_v51, %s1459_s8 }
 0x10d   :  { %v253_v53 = vpop.f32.mrf.mxu1 }
 0x10e   :  { %v313_v54 = vpop.f32.mrf.mxu0  ;;  %v254_v14 = vadd.f32 %v253_v53, %v196_v4 }
 0x10f   :  { %v314_v5 = vadd.f32 %v313_v54, %v199_v60 }
 0x111   :  { %v616_v15 = vrot.slane %v314_v5, 5 }
 0x113   :  { %v273_v56 = vpop.f32.mrf.mxu2 }
 0x114   :  { %v293_v59 = vpop.f32.mrf.mxu3  ;;  %v274_v62 = vadd.f32 %v273_v56, %v197_v57 }
 0x115   :  { %v294_v63 = vadd.f32 %v293_v59, %v198_v58 }
 0x116   :  { %v333_v0 = vpop.f32.mrf.mxu1  ;;  %v614_v8 = vrot.slane %v274_v62, 7 }
 0x117   :  { %v393_v2 = vpop.f32.mrf.mxu0  ;;  %v334_v7 = vadd.f32 %v333_v0, %v200_v61  ;;  %v615_v9 = vrot.slane %v294_v63, 6 }
 0x118   :  { %v394_v10 = vadd.f32 %v393_v2, %v203_v1  ;;  %v629_v19 = vsel %vm58_vm0, %v254_v14, %v614_v8  ;;  %v192_v8 = vld [vmem:[%s1905_s3 + $0x10] sm:$0x3]  ;;  %s1466_s3 = smov 17  }
 0x119   :  { %v617_v17 = vrot.slane %v334_v7, 4  ;;  %v631_v20 = vsel %vm630_vm3, %v615_v9, %v616_v15  ;;  %v212_v14 = vperm.slane %v192_v8, 0  ;;  %v655_v15 = vlaneseq }
 0x11a   :  { %v620_v21 = vrot.slane %v394_v10, 1  ;;  %v633_v25 = vsel %vm632_vm4, %v629_v19, %v631_v20 }
 0x11b   :  { %vm657_vm9 = vcmp.lt.s32.totalorder %v655_v15, 256 }
 0x11c   :  { %v353_v11 = vpop.f32.mrf.mxu2 }
 0x11d   :  { %v354_v12 = vadd.f32 %v353_v11, %v201_v3  ;;  %v373_v13 = vpop.f32.mrf.mxu3  ;;  %v213_v11 = vperm.slane %v192_v8, 1 }
 0x11e   :  { %v374_v16 = vadd.f32 %v373_v13, %v202_v6 }
 0x11f   :  { %v618_v18 = vrot.slane %v354_v12, 3 }
 0x120   :  { %v619_v22 = vrot.slane %v374_v16, 2 }
 0x121   :  { %v635_v23 = vsel %vm634_vm5, %v617_v17, %v618_v18 }
 0x122   :  { %v637_v24 = vsel %vm636_vm6, %v619_v22, %v620_v21  ;;  %v413_v28 = vpop.f32.mrf.mxu1 }
 0x123   :  { %v639_v26 = vsel %vm638_vm7, %v635_v23, %v637_v24  ;;  %v473_v29 = vpop.f32.mrf.mxu0  ;;  %v414_v56 = vadd.f32 %v413_v28, %v204_v45 }
 0x124   :  { %v641_v27 = vsel %vm640_vm8, %v633_v25, %v639_v26  ;;  %v474_v48 = vadd.f32 %v473_v29, %v207_v35 }
 0x125   :  { %653 = vst [vmem:[#allocation2] sm:$0xff] %v641_v27 }
 0x126   :  { %v623_v59 = vrot.slane %v474_v48, 5  ;;  %v1612_v48 = vpop.permute.xlu2 %1127 }
 0x128   :  { %v433_v31 = vpop.f32.mrf.mxu2 }
 0x129   :  { %v453_v33 = vpop.f32.mrf.mxu3  ;;  %v434_v38 = vadd.f32 %v433_v31, %v205_v32 }
 0x12a   :  { %v454_v41 = vadd.f32 %v453_v33, %v206_v34 }
 0x12b   :  { %v621_v51 = vrot.slane %v434_v38, 7 }
 0x12c   :  { %v1378_v37 = vld [vmem:[#allocation2 + $0x1] ss:$0 sm:$0xff]  ;;  %v1379_v40 = vld [vmem:[#allocation2] ss:$0 sm:$0xff]  ;;  %v493_v42 = vpop.f32.mrf.mxu1  ;;  %v622_v53 = vrot.slane %v454_v41, 6 }
 0x12d   :  { %v689_v39 = vld [vmem:[#allocation2] sm:$0x3]  ;;  %704 = vrot.lane.b32.xlu2 %v1378_v37, %s1460_s13  ;;  %v553_v46 = vpop.f32.mrf.mxu0  ;;  %677 = vrot.lane.b32.xlu0 %v1379_v40, %s1461_s14  ;;  %v494_v52 = vadd.f32 %v493_v42, %v208_v36  ;;  %v642_v62 = vsel %vm58_vm0, %v414_v56, %v621_v51  ;;  %v1382_v16 = vld [vmem:[#allocation2 + $0x2] ss:$0 sm:$0xff]  ;;  %v1383_v25 = vld [vmem:[#allocation2 + $0x3] ss:$0 sm:$0xff] }
 0x12e   :  { %v691_v44 = vperm.slane %v689_v39, 0  ;;  %v554_v54 = vadd.f32 %v553_v46, %v211_v43  ;;  %v1380_v61 = vld [vmem:[#allocation2 + $0x1] ss:$0 sm:$0xff]  ;;  %v1381_v1 = vld [vmem:[#allocation2] ss:$0 sm:$0xff]  ;;  %v643_v2 = vsel %vm630_vm3, %v622_v53, %v623_v59  ;;  %v692_v5 = vperm.slane %v689_v39, 1  ;;  %v1618_v56 = vpop.permute.xlu2 %1139 }
 0x12f   :  { %v624_v63 = vrot.slane %v494_v52, 4  ;;  %v644_v9 = vsel %vm632_vm4, %v642_v62, %v643_v2  ;;  %v715_v13 = vld [vmem:[#allocation2 + $0x1] sm:$0x3]  ;;  %v1384_v27 = vld [vmem:[#allocation2 + $0x3] ss:$0 sm:$0xff]  ;;  %v1629_v2 = vpop.permute.xlu1 %1119 }
 0x130   :  { %693 = vrot.lane.b32.xlu1 %v691_v44, %s1462_s15  ;;  %v627_v3 = vrot.slane %v554_v54, 1  ;;  %v717_v19 = vperm.slane %v715_v13, 0  ;;  %v718_v21 = vperm.slane %v715_v13, 1  ;;  %v1385_v26 = vld [vmem:[#allocation2 + $0x2] ss:$0 sm:$0xff] }
 0x131   :  { %v755_v28 = vld [vmem:[#allocation2 + $0x3] sm:$0x3]  ;;  %v1388_v36 = vld [vmem:[#allocation2 + $0x6] ss:$0 sm:$0xff]  ;;  %v1390_v37 = vld [vmem:[#allocation2 + $0x5] ss:$0 sm:$0xff] }
 0x132   :  { %v513_v55 = vpop.f32.mrf.mxu2  ;;  %v1386_v29 = vld [vmem:[#allocation2 + $0x4] ss:$0 sm:$0xff]  ;;  %v757_v30 = vperm.slane %v755_v28, 0  ;;  %v758_v31 = vperm.slane %v755_v28, 1  ;;  %v1389_v38 = vld [vmem:[#allocation2 + $0x5] ss:$0 sm:$0xff] }
 0x133   :  { %v514_v57 = vadd.f32 %v513_v55, %v209_v47  ;;  %v533_v58 = vpop.f32.mrf.mxu3  ;;  %v780_v32 = vld [vmem:[#allocation2 + $0x4] sm:$0x3]  ;;  %v819_v39 = vld [vmem:[#allocation2 + $0x6] sm:$0x3] }
 0x134   :  { %v534_v60 = vadd.f32 %v533_v58, %v210_v49  ;;  %v783_v33 = vperm.slane %v780_v32, 1  ;;  %v1387_v34 = vld [vmem:[#allocation2 + $0x4] ss:$0 sm:$0xff]  ;;  %v782_v35 = vperm.slane %v780_v32, 0  ;;  %v822_v40 = vperm.slane %v819_v39, 1 }
 0x135   :  { %v625_v0 = vrot.slane %v514_v57, 3  ;;  %711 = vrot.lane.b32.xlu2 %v1380_v61, %s1463_s16  ;;  %685 = vrot.lane.b32.xlu0 %v1381_v1, %s1464_s17  ;;  %v1391_v41 = vld [vmem:[#allocation2 + $0x6] ss:$0 sm:$0xff]  ;;  %v821_v42 = vperm.slane %v819_v39, 0  ;;  %v1393_v45 = vld [vmem:[#allocation2 + $0x7] ss:$0 sm:$0xff] }
 0x136   :  { %v626_v4 = vrot.slane %v534_v60, 2  ;;  %v1392_v46 = vld [vmem:[#allocation2 + $0x7] ss:$0 sm:$0xff] }
 0x137   :  { %v645_v6 = vsel %vm634_vm5, %v624_v63, %v625_v0  ;;  %v573_v17 = vpop.f32.mrf.mxu1  ;;  %v1626_v0 = vpop.permute.xlu0 %1123 }
 0x138   :  { %v646_v7 = vsel %vm636_vm6, %v626_v4, %v627_v3  ;;  %695 = vrot.lane.b32.xlu1 %v692_v5, %s1462_s15  ;;  %v574_v22 = vadd.f32 %v573_v17, %v212_v14  ;;  %v1639_v8 = vpop.permute.xlu1 %1131 }
 0x139   :  { %v647_v10 = vsel %vm638_vm7, %v645_v6, %v646_v7 }
 0x13a   :  { %v648_v12 = vsel %vm640_vm8, %v644_v9, %v647_v10 }
 0x13b   :  { %654 = vst [vmem:[#allocation2 + $0x8] sm:$0xff] %v648_v12 }
 0x13d   :  { %v593_v18 = vpop.f32.mrf.mxu2  ;;  %730 = vrot.lane.b32.xlu2 %v1382_v16, %s1465_s20  ;;  %719 = vrot.lane.b32.xlu0 %v717_v19, %s1466_s3 }
 0x13e   :  { %v594_v20 = vadd.f32 %v593_v18, %v213_v11 }
 0x13f   :  { %v1636_v7 = vpop.permute.xlu0 %1135 }
 0x140   :  { %v628_v23 = vrot.slane %v594_v20, 7  ;;  %721 = vrot.lane.b32.xlu1 %v718_v21, %s1466_s3 }
 0x142   :  { %v649_v24 = vsel %vm58_vm0, %v574_v22, %v628_v23  ;;  %v844_v43 = vld [vmem:[#allocation2 + $0x7] sm:$0x3]  ;;  %v883_v52 = vld [vmem:[#allocation2 + $0x9] sm:$0x3]  ;;  %v1400_v62 = vld [vmem:[#allocation2 + $0xb] ss:$0 sm:$0xff] }
 0x143   :  { %659 = vst.msk [vmem:[#allocation2 + $0x10] sm:$0x3] %vm657_vm9, %v649_v24  ;;  %v846_v44 = vperm.slane %v844_v43, 0  ;;  %v1394_v47 = vld [vmem:[#allocation2 + $0x8] ss:$0 sm:$0xff]  ;;  %v847_v49 = vperm.slane %v844_v43, 1 }
 0x144   :  { %v1395_v51 = vld [vmem:[#allocation2 + $0x8] ss:$0 sm:$0xff]  ;;  %v885_v53 = vperm.slane %v883_v52, 0  ;;  %v1397_v54 = vld [vmem:[#allocation2 + $0x9] ss:$0 sm:$0xff]  ;;  %v886_v58 = vperm.slane %v883_v52, 1 }
 0x145   :  { %751 = vrot.lane.b32.xlu2 %v1383_v25, %s1464_s17  ;;  %737 = vrot.lane.b32.xlu0 %v1385_v26, %s1467_s21  ;;  %v1396_v55 = vld [vmem:[#allocation2 + $0x9] ss:$0 sm:$0xff]  ;;  %v1398_v57 = vld [vmem:[#allocation2 + $0xa] ss:$0 sm:$0xff]  ;;  %v1401_v4 = vld [vmem:[#allocation2 + $0xc] ss:$0 sm:$0xff] }
 0x146   :  { %v1399_v59 = vld [vmem:[#allocation2 + $0xa] ss:$0 sm:$0xff]  ;;  %v1403_v5 = vld [vmem:[#allocation2 + $0xb] ss:$0 sm:$0xff]  ;;  %v1402_v6 = vld [vmem:[#allocation2 + $0xc] ss:$0 sm:$0xff] }
 0x147   :  { %v908_v61 = vld [vmem:[#allocation2 + $0xa] sm:$0x3]  ;;  %v947_v10 = vld [vmem:[#allocation2 + $0xc] sm:$0x3]  ;;  %v1406_v25 = vld [vmem:[#allocation2 + $0xf] ss:$0 sm:$0xff] }
 0x148   :  { %744 = vrot.lane.b32.xlu1 %v1384_v27, %s1461_s14  ;;  %v910_v63 = vperm.slane %v908_v61, 0  ;;  %v911_v1 = vperm.slane %v908_v61, 1  ;;  %v1404_v11 = vld [vmem:[#allocation2 + $0xd] ss:$0 sm:$0xff]  ;;  %v949_v12 = vperm.slane %v947_v10, 0  ;;  %v950_v13 = vperm.slane %v947_v10, 1 }
 0x149   :  { %v972_v16 = vld [vmem:[#allocation2 + $0xd] sm:$0x3]  ;;  %v1087_v61 = vld [vmem:[#allocation3 + $0x68] sm:$0x1]  ;;  %v1692_v10 = vstv %s1361_s23 }
 0x14a   :  { %v975_v18 = vperm.slane %v972_v16, 1  ;;  %v1405_v19 = vld [vmem:[#allocation2 + $0xd] ss:$0 sm:$0xff]  ;;  %v974_v20 = vperm.slane %v972_v16, 0  ;;  %v1408_v26 = vld [vmem:[#allocation2 + $0xe] ss:$0 sm:$0xff] }
 0x14b   :  { %v1407_v27 = vld [vmem:[#allocation2 + $0xe] ss:$0 sm:$0xff]  ;;  %v1412_v52 = vld [vmem:[#allocation2 + $0x11] ss:$0 sm:$0xff] }
 0x14d   :  { %769 = vrot.lane.b32.xlu2 %v1386_v29, %s1460_s13  ;;  %759 = vrot.lane.b32.xlu0 %v757_v30, %s1462_s15  ;;  %v1011_v30 = vld [vmem:[#allocation2 + $0xf] sm:$0x3] }
 0x150   :  { %761 = vrot.lane.b32.xlu1 %v758_v31, %s1462_s15 }
 0x155   :  { %786 = vrot.lane.b32.xlu2 %v783_v33, %s1466_s3  ;;  %776 = vrot.lane.b32.xlu0 %v1387_v34, %s1463_s16  ;;  %v1014_v33 = vperm.slane %v1011_v30, 1  ;;  %v1409_v34 = vld [vmem:[#allocation2 + $0xf] ss:$0 sm:$0xff] }
 0x158   :  { %784 = vrot.lane.b32.xlu1 %v782_v35, %s1466_s3  ;;  %v1013_v35 = vperm.slane %v1011_v30, 0 }
 0x15d   :  { %808 = vrot.lane.b32.xlu2 %v1388_v36, %s1461_s14  ;;  %794 = vrot.lane.b32.xlu0 %v1390_v37, %s1465_s20 }
 0x160   :  { %801 = vrot.lane.b32.xlu1 %v1389_v38, %s1467_s21  ;;  %v1036_v38 = vld [vmem:[#allocation2 + $0x10] sm:$0x3] }
 0x165   :  { %825 = vrot.lane.b32.xlu2 %v822_v40, %s1462_s15  ;;  %815 = vrot.lane.b32.xlu0 %v1391_v41, %s1464_s17  ;;  %v1038_v40 = vperm.slane %v1036_v38, 0  ;;  %v1411_v41 = vld [vmem:[#allocation2 + $0x10] ss:$0 sm:$0xff] }
 0x168   :  { %823 = vrot.lane.b32.xlu1 %v821_v42, %s1462_s15  ;;  %v1410_v42 = vld [vmem:[#allocation2 + $0x10] ss:$0 sm:$0xff] }
 0x16d   :  { %848 = vrot.lane.b32.xlu2 %v846_v44, %s1466_s3  ;;  %833 = vrot.lane.b32.xlu0 %v1393_v45, %s1460_s13  ;;  %v1212_v45 = vld [vmem:[#allocation3 + $0x8] sm:$0xfe] }
 0x170   :  { %840 = vrot.lane.b32.xlu1 %v1392_v46, %s1463_s16  ;;  %v1668_v46 = vstv %s1362_s22 }
 0x175   :  { %865 = vrot.lane.b32.xlu2 %v1394_v47, %s1467_s21  ;;  %850 = vrot.lane.b32.xlu0 %v847_v49, %s1466_s3  ;;  %v1220_v49 = vmul.f32 0.0, %v1668_v46 }
 0x178   :  { %858 = vrot.lane.b32.xlu1 %v1395_v51, %s1465_s20 }
 0x17d   :  { %887 = vrot.lane.b32.xlu2 %v885_v53, %s1462_s15  ;;  %872 = vrot.lane.b32.xlu0 %v1397_v54, %s1461_s14  ;;  %v1216_v53 = vmul.f32 %v1668_v46, %v1212_v45  ;;  %v1039_v54 = vperm.slane %v1036_v38, 1 }
 0x180   :  { %879 = vrot.lane.b32.xlu1 %v1396_v55, %s1464_s17  ;;  %v1413_v55 = vld [vmem:[#allocation2 + $0x11] ss:$0 sm:$0xff] }
 0x185   :  { %904 = vrot.lane.b32.xlu2 %v1398_v57, %s1463_s16  ;;  %889 = vrot.lane.b32.xlu0 %v886_v58, %s1462_s15  ;;  %v1675_v57 = vrot.slane %v1220_v49, 1 }
 0x187   :  { %v705_v60 = vpop.permute.xlu2 %704 }
 0x188   :  { %897 = vrot.lane.b32.xlu1 %v1399_v59, %s1460_s13  ;;  %707 = vst.msk [vmem:[#allocation3 + $0x4] sm:$0x1] %vm680_vm10, %v705_v60  ;;  %v1246_v59 = vrot.slane %v1216_v53, 1 }
 0x18d   :  { %922 = vrot.lane.b32.xlu2 %v1400_v62, %s1465_s20  ;;  %912 = vrot.lane.b32.xlu0 %v910_v63, %s1466_s3 }
 0x18f   :  { %v712_v3 = vpop.permute.xlu2 %711 }
 0x190   :  { %914 = vrot.lane.b32.xlu1 %v911_v1, %s1466_s3  ;;  %714 = vst.msk [vmem:[#allocation3 + $0x5] sm:$0x1] %vm680_vm10, %v712_v3  ;;  %v1248_v1 = vsel %vm1184_vm13, %v1246_v59, %v1675_v57  ;;  %v1102_v3 = vmul.f32 %v1552_v50, %v1087_v61 }
 0x195   :  { %943 = vrot.lane.b32.xlu2 %v1401_v4, %s1464_s17  ;;  %929 = vrot.lane.b32.xlu0 %v1403_v5, %s1467_s21 }
 0x197   :  { %v731_v9 = vpop.permute.xlu2 %730 }
 0x198   :  { %936 = vrot.lane.b32.xlu1 %v1402_v6, %s1461_s14  ;;  %733 = vst.msk [vmem:[#allocation3 + $0x7] sm:$0x1] %vm680_vm10, %v731_v9 }
 0x19d   :  { %961 = vrot.lane.b32.xlu2 %v1404_v11, %s1460_s13  ;;  %951 = vrot.lane.b32.xlu0 %v949_v12, %s1462_s15 }
 0x19f   :  { %v752_v14 = vpop.permute.xlu2 %751  ;;  %v678_v15 = vpop.permute.xlu0 %677 }
 0x1a0   :  { %953 = vrot.lane.b32.xlu1 %v950_v13, %s1462_s15  ;;  %754 = vst.msk [vmem:[#allocation3 + $0x12] sm:$0x1] %vm680_vm10, %v752_v14 }
 0x1a1   :  { %681 = vst.msk [vmem:[#allocation3 + $0x1] sm:$0x1] %vm680_vm10, %v678_v15 }
 0x1a2   :  { %v694_v17 = vpop.permute.xlu1 %693 }
 0x1a5   :  { %978 = vrot.lane.b32.xlu2 %v975_v18, %s1466_s3  ;;  %968 = vrot.lane.b32.xlu0 %v1405_v19, %s1463_s16 }
 0x1a7   :  { %v770_v21 = vpop.permute.xlu2 %769  ;;  %v686_v22 = vpop.permute.xlu0 %685 }
 0x1a8   :  { %976 = vrot.lane.b32.xlu1 %v974_v20, %s1466_s3  ;;  %772 = vst.msk [vmem:[#allocation3 + $0x14] sm:$0x1] %vm680_vm10, %v770_v21 }
 0x1a9   :  { %688 = vst.msk [vmem:[#allocation3 + $0x2] sm:$0x1] %vm680_vm10, %v686_v22 }
 0x1aa   :  { %v696_v23 = vpop.permute.xlu1 %695 }
 0x1ab   :  { %v698_v24 = vsel %vm697_vm11, %v694_v17, %v696_v23 }
 0x1ac   :  { %700 = vst.msk [vmem:[#allocation3 + $0x3] sm:$0x1] %vm680_vm10, %v698_v24 }
 0x1ad   :  { %1000 = vrot.lane.b32.xlu2 %v1406_v25, %s1461_s14  ;;  %986 = vrot.lane.b32.xlu0 %v1408_v26, %s1465_s20 }
 0x1af   :  { %v787_v28 = vpop.permute.xlu2 %786  ;;  %v720_v29 = vpop.permute.xlu0 %719 }
 0x1b0   :  { %993 = vrot.lane.b32.xlu1 %v1407_v27, %s1467_s21 }
 0x1b2   :  { %v722_v31 = vpop.permute.xlu1 %721 }
 0x1b3   :  { %v724_v32 = vsel %vm723_vm12, %v720_v29, %v722_v31 }
 0x1b4   :  { %726 = vst.msk [vmem:[#allocation3 + $0x6] sm:$0x1] %vm680_vm10, %v724_v32 }
 0x1b5   :  { %1017 = vrot.lane.b32.xlu2 %v1014_v33, %s1462_s15  ;;  %1007 = vrot.lane.b32.xlu0 %v1409_v34, %s1464_s17 }
 0x1b7   :  { %v809_v36 = vpop.permute.xlu2 %808  ;;  %v738_v37 = vpop.permute.xlu0 %737 }
 0x1b8   :  { %1015 = vrot.lane.b32.xlu1 %v1013_v35, %s1462_s15  ;;  %811 = vst.msk [vmem:[#allocation3 + $0x21] sm:$0x1] %vm680_vm10, %v809_v36 }
 0x1b9   :  { %740 = vst.msk [vmem:[#allocation3 + $0x10] sm:$0x1] %vm680_vm10, %v738_v37 }
 0x1ba   :  { %v745_v39 = vpop.permute.xlu1 %744 }
 0x1bb   :  { %747 = vst.msk [vmem:[#allocation3 + $0x11] sm:$0x1] %vm680_vm10, %v745_v39  ;;  %v1167_v9 = vld [vmem:[#allocation3] sm:$0xfe] }
 0x1bc   :  { %v1170_v12 = vmul.f32 %v1692_v10, %v1167_v9  ;;  %v1704_v16 = vld [vmem:[#allocation3] sm:$0xff]  ;;  %v1215_v25 = vmul.f32 %v1668_v46, %v1167_v9 }
 0x1bd   :  { %1040 = vrot.lane.b32.xlu2 %v1038_v40, %s1466_s3  ;;  %1025 = vrot.lane.b32.xlu0 %v1411_v41, %s1460_s13  ;;  %v1089_v22 = vmul.f32 %v1552_v50, %v1704_v16 }
 0x1be   :  { %v1185_v20 = vrot.slane %v1170_v12, 1  ;;  %v1243_v30 = vrot.slane %v1215_v25, 1 }
 0x1bf   :  { %v826_v43 = vpop.permute.xlu2 %825  ;;  %v760_v44 = vpop.permute.xlu0 %759 }
 0x1c0   :  { %1032 = vrot.lane.b32.xlu1 %v1410_v42, %s1463_s16 }
 0x1c2   :  { %v762_v47 = vpop.permute.xlu1 %761 }
 0x1c3   :  { %v763_v51 = vsel %vm697_vm11, %v760_v44, %v762_v47 }
 0x1c4   :  { %765 = vst.msk [vmem:[#allocation3 + $0x13] sm:$0x1] %vm680_vm10, %v763_v51 }
 0x1c5   :  { %1057 = vrot.lane.b32.xlu2 %v1412_v52, %s1467_s21  ;;  %1042 = vrot.lane.b32.xlu0 %v1039_v54, %s1466_s3 }
 0x1c7   :  { %v849_v58 = vpop.permute.xlu2 %848  ;;  %v777_v60 = vpop.permute.xlu0 %776 }
 0x1c8   :  { %1050 = vrot.lane.b32.xlu1 %v1413_v55, %s1465_s20  ;;  %779 = vst.msk [vmem:[#allocation3 + $0x15] sm:$0x1] %vm680_vm10, %v777_v60 }
 0x1ca   :  { %v785_v62 = vpop.permute.xlu1 %784 }
 0x1cb   :  { %v788_v63 = vsel %vm723_vm12, %v785_v62, %v787_v28 }
 0x1cc   :  { %790 = vst.msk [vmem:[#allocation3 + $0x16] sm:$0x1] %vm680_vm10, %v788_v63 }
 0x1cd   :  { %1275 = vrot.lane.b32.xlu2 %v1675_v57, %s1459_s8  ;;  %1271 = vrot.lane.b32.xlu0 %v1248_v1, %s1459_s8 }
 0x1cf   :  { %v866_v4 = vpop.permute.xlu2 %865  ;;  %v795_v5 = vpop.permute.xlu0 %794 }
 0x1d0   :  { %1143 = vrot.lane.b32.xlu1 %v1102_v3, %s1459_s8  ;;  %868 = vst.msk [vmem:[#allocation3 + $0x30] sm:$0x1] %vm680_vm10, %v866_v4 }
 0x1d1   :  { %797 = vst.msk [vmem:[#allocation3 + $0x17] sm:$0x1] %vm680_vm10, %v795_v5 }
 0x1d2   :  { %v802_v6 = vpop.permute.xlu1 %801 }
 0x1d3   :  { %804 = vst.msk [vmem:[#allocation3 + $0x20] sm:$0x1] %vm680_vm10, %v802_v6 }
 0x1d5   :  { %1287 = vrot.lane.b32.xlu2 %v1675_v57, %s1459_s8  ;;  %1283 = vrot.lane.b32.xlu0 %v1675_v57, %s1459_s8 }
 0x1d7   :  { %v888_v11 = vpop.permute.xlu2 %887  ;;  %v816_v13 = vpop.permute.xlu0 %815 }
 0x1d8   :  { %1279 = vrot.lane.b32.xlu1 %v1675_v57, %s1459_s8  ;;  %v1701_v14 = vld [vmem:[#allocation3 + $0x10] sm:$0xff]  ;;  %818 = vst.msk [vmem:[#allocation3 + $0x22] sm:$0x1] %vm680_vm10, %v816_v13 }
 0x1d9   :  { %v1171_v17 = vmul.f32 %v1692_v10, %v1701_v14  ;;  %v1091_v19 = vmul.f32 %v1552_v50, %v1701_v14  ;;  %v1217_v23 = vmul.f32 %v1668_v46, %v1701_v14 }
 0x1da   :  { %v824_v15 = vpop.permute.xlu1 %823 }
 0x1db   :  { %v827_v18 = vsel %vm697_vm11, %v824_v15, %v826_v43  ;;  %v1186_v21 = vrot.slane %v1171_v17, 1  ;;  %v1244_v28 = vrot.slane %v1217_v23, 1 }
 0x1dc   :  { %829 = vst.msk [vmem:[#allocation3 + $0x23] sm:$0x1] %vm680_vm10, %v827_v18 }
 0x1dd   :  { %1121 = vrot.lane.b32.xlu2 %v1091_v19, %s1459_s8  ;;  %v1718_v24 = vsel %vm1184_vm13, %v1185_v20, %v1186_v21  ;;  %1117 = vrot.lane.b32.xlu0 %v1089_v22, %s1459_s8  ;;  %v1245_v31 = vsel %vm1184_vm13, %v1243_v30, %v1244_v28 }
 0x1df   :  { %v905_v26 = vpop.permute.xlu2 %904  ;;  %v834_v27 = vpop.permute.xlu0 %833 }
 0x1e0   :  { %907 = vst.msk [vmem:[#allocation3 + $0x35] sm:$0x1] %vm680_vm10, %v905_v26 }
 0x1e1   :  { %836 = vst.msk [vmem:[#allocation3 + $0x24] sm:$0x1] %vm680_vm10, %v834_v27 }
 0x1e2   :  { %v841_v29 = vpop.permute.xlu1 %840 }
 0x1e3   :  { %843 = vst.msk [vmem:[#allocation3 + $0x25] sm:$0x1] %vm680_vm10, %v841_v29 }
 0x1e5   :  { %1269 = vrot.lane.b32.xlu2 %v1245_v31, %s1459_s8 }
 0x1e7   :  { %v923_v32 = vpop.permute.xlu2 %922  ;;  %v851_v33 = vpop.permute.xlu0 %850 }
 0x1e8   :  { %925 = vst.msk [vmem:[#allocation3 + $0x37] sm:$0x1] %vm680_vm10, %v923_v32  ;;  %v852_v35 = vsel %vm723_vm12, %v849_v58, %v851_v33 }
 0x1e9   :  { %854 = vst.msk [vmem:[#allocation3 + $0x26] sm:$0x1] %vm680_vm10, %v852_v35 }
 0x1ea   :  { %v859_v34 = vpop.permute.xlu1 %858 }
 0x1eb   :  { %861 = vst.msk [vmem:[#allocation3 + $0x27] sm:$0x1] %vm680_vm10, %v859_v34 }
 0x1ef   :  { %v944_v36 = vpop.permute.xlu2 %943  ;;  %v873_v37 = vpop.permute.xlu0 %872 }
 0x1f0   :  { %946 = vst.msk [vmem:[#allocation3 + $0x42] sm:$0x1] %vm680_vm10, %v944_v36 }
 0x1f1   :  { %875 = vst.msk [vmem:[#allocation3 + $0x31] sm:$0x1] %vm680_vm10, %v873_v37 }
 0x1f2   :  { %v880_v38 = vpop.permute.xlu1 %879  ;;  %v1734_v39 = vld [vmem:[#allocation3 + $0x20] sm:$0xff] }
 0x1f3   :  { %882 = vst.msk [vmem:[#allocation3 + $0x32] sm:$0x1] %vm680_vm10, %v880_v38  ;;  %v1093_v40 = vmul.f32 %v1552_v50, %v1734_v39  ;;  %v1172_v41 = vmul.f32 %v1692_v10, %v1734_v39  ;;  %v1219_v42 = vmul.f32 %v1668_v46, %v1734_v39 }
 0x1f5   :  { %1125 = vrot.lane.b32.xlu1 %v1093_v40, %s1459_s8  ;;  %v1188_v43 = vrot.slane %v1172_v41, 1  ;;  %v1249_v49 = vrot.slane %v1219_v42, 1 }
 0x1f7   :  { %v962_v44 = vpop.permute.xlu2 %961  ;;  %v1744_v45 = vsel %vm1184_vm13, %v1186_v21, %v1188_v43  ;;  %v890_v47 = vpop.permute.xlu0 %889  ;;  %v1250_v53 = vsel %vm1184_vm13, %v1244_v28, %v1249_v49 }
 0x1f8   :  { %964 = vst.msk [vmem:[#allocation3 + $0x44] sm:$0x1] %vm680_vm10, %v962_v44  ;;  %v891_v52 = vsel %vm697_vm11, %v888_v11, %v890_v47 }
 0x1f9   :  { %893 = vst.msk [vmem:[#allocation3 + $0x33] sm:$0x1] %vm680_vm10, %v891_v52 }
 0x1fa   :  { %v898_v51 = vpop.permute.xlu1 %897 }
 0x1fb   :  { %900 = vst.msk [vmem:[#allocation3 + $0x34] sm:$0x1] %vm680_vm10, %v898_v51 }
 0x1fd   :  { %1273 = vrot.lane.b32.xlu1 %v1250_v53, %s1459_s8 }
 0x1ff   :  { %v979_v54 = vpop.permute.xlu2 %978  ;;  %v913_v55 = vpop.permute.xlu0 %912 }
 0x202   :  { %v915_v58 = vpop.permute.xlu1 %914 }
 0x203   :  { %v916_v59 = vsel %vm723_vm12, %v913_v55, %v915_v58 }
 0x204   :  { %918 = vst.msk [vmem:[#allocation3 + $0x36] sm:$0x1] %vm680_vm10, %v916_v59 }
 0x207   :  { %v1001_v60 = vpop.permute.xlu2 %1000  ;;  %v930_v61 = vpop.permute.xlu0 %929 }
 0x208   :  { %1003 = vst.msk [vmem:[#allocation3 + $0x51] sm:$0x1] %vm680_vm10, %v1001_v60 }
 0x209   :  { %932 = vst.msk [vmem:[#allocation3 + $0x40] sm:$0x1] %vm680_vm10, %v930_v61 }
 0x20a   :  { %v937_v62 = vpop.permute.xlu1 %936 }
 0x20b   :  { %939 = vst.msk [vmem:[#allocation3 + $0x41] sm:$0x1] %vm680_vm10, %v937_v62  ;;  %v1757_v63 = vld [vmem:[#allocation3 + $0x30] sm:$0xff] }
 0x20c   :  { %v1095_v1 = vmul.f32 %v1552_v50, %v1757_v63  ;;  %v1173_v3 = vmul.f32 %v1692_v10, %v1757_v63  ;;  %v1221_v4 = vmul.f32 %v1668_v46, %v1757_v63 }
 0x20e   :  { %1129 = vrot.lane.b32.xlu0 %v1095_v1, %s1459_s8  ;;  %v1190_v5 = vrot.slane %v1173_v3, 1  ;;  %v1253_v12 = vrot.slane %v1221_v4, 1 }
 0x20f   :  { %v1018_v6 = vpop.permute.xlu2 %1017  ;;  %v952_v11 = vpop.permute.xlu0 %951 }
 0x210   :  { %v1767_v9 = vsel %vm1184_vm13, %v1188_v43, %v1190_v5  ;;  %v1254_v17 = vsel %vm1184_vm13, %v1249_v49, %v1253_v12  ;;  %v1808_v49 = vstv %s1359_s24 }
 0x211   :  { %v1075_v52 = vmul.f32 %v1808_v49, %v1701_v14 }
 0x212   :  { %v954_v13 = vpop.permute.xlu1 %953 }
 0x213   :  { %v955_v15 = vsel %vm697_vm11, %v952_v11, %v954_v13 }
 0x214   :  { %957 = vst.msk [vmem:[#allocation3 + $0x43] sm:$0x1] %vm680_vm10, %v955_v15 }
 0x216   :  { %1277 = vrot.lane.b32.xlu0 %v1254_v17, %s1459_s8 }
 0x217   :  { %v1041_v18 = vpop.permute.xlu2 %1040  ;;  %v969_v19 = vpop.permute.xlu0 %968 }
 0x218   :  { %971 = vst.msk [vmem:[#allocation3 + $0x45] sm:$0x1] %vm680_vm10, %v969_v19  ;;  %v1074_v19 = vmul.f32 %v1808_v49, %v1704_v16 }
 0x21a   :  { %v977_v20 = vpop.permute.xlu1 %976 }
 0x21b   :  { %v980_v21 = vsel %vm723_vm12, %v977_v20, %v979_v54 }
 0x21c   :  { %982 = vst.msk [vmem:[#allocation3 + $0x46] sm:$0x1] %vm680_vm10, %v980_v21 }
 0x21f   :  { %v1058_v22 = vpop.permute.xlu2 %1057  ;;  %v987_v23 = vpop.permute.xlu0 %986 }
 0x220   :  { %1060 = vst.msk [vmem:[#allocation3 + $0x60] sm:$0x1] %vm680_vm10, %v1058_v22 }
 0x221   :  { %989 = vst.msk [vmem:[#allocation3 + $0x47] sm:$0x1] %vm680_vm10, %v987_v23 }
 0x222   :  { %v994_v25 = vpop.permute.xlu1 %993 }
 0x223   :  { %996 = vst.msk [vmem:[#allocation3 + $0x50] sm:$0x1] %vm680_vm10, %v994_v25 }
 0x227   :  { %v1779_v26 = vpop.permute.xlu2 %1275  ;;  %v1781_v27 = vld [vmem:[#allocation3 + $0x60] sm:$0x1]  ;;  %v1008_v28 = vpop.permute.xlu0 %1007 }
 0x228   :  { %v1101_v29 = vmul.f32 %v1552_v50, %v1781_v27  ;;  %v1785_v30 = vld [vmem:[#allocation3 + $0x40] sm:$0xff]  ;;  %1010 = vst.msk [vmem:[#allocation3 + $0x52] sm:$0x1] %vm680_vm10, %v1008_v28 }
 0x229   :  { %v1097_v32 = vmul.f32 %v1552_v50, %v1785_v30  ;;  %v1174_v33 = vmul.f32 %v1692_v10, %v1785_v30  ;;  %v1223_v35 = vmul.f32 %v1668_v46, %v1785_v30  ;;  %v1168_v44 = vld [vmem:[#allocation3 + $0x60] sm:$0x3] }
 0x22a   :  { %v1016_v31 = vpop.permute.xlu1 %1015  ;;  %1141 = vrot.lane.b32.xlu0 %v1101_v29, %s1459_s8  ;;  %v1227_v47 = vmul.f32 %v1668_v46, %v1168_v44  ;;  %v1820_v14 = vmul.f32 %v1692_v10, %v1168_v44 }
 0x22b   :  { %v1019_v34 = vsel %vm697_vm11, %v1016_v31, %v1018_v6  ;;  %1133 = vrot.lane.b32.xlu2 %v1097_v32, %s1459_s8  ;;  %v1192_v36 = vrot.slane %v1174_v33, 1  ;;  %v1257_v38 = vrot.slane %v1223_v35, 1  ;;  %v1213_v6 = vld [vmem:[#allocation3 + $0x68] sm:$0x3]  ;;  %v1318_v31 = vstv %s1363_s25 }
 0x22c   :  { %1021 = vst.msk [vmem:[#allocation3 + $0x53] sm:$0x1] %vm680_vm10, %v1019_v34  ;;  %v1265_v60 = vrot.slane %v1227_v47, 1  ;;  %v1196_v11 = vrot.slane %v1820_v14, 1  ;;  %v1228_v17 = vmul.f32 %v1668_v46, %v1213_v6  ;;  %v1076_v34 = vmul.f32 %v1808_v49, %v1734_v39 }
 0x22d   :  { %v1799_v37 = vsel %vm1184_vm13, %v1190_v5, %v1192_v36  ;;  %v1258_v43 = vsel %vm1184_vm13, %v1253_v12, %v1257_v38 }
 0x22f   :  { %v1801_v40 = vpop.permute.xlu2 %1287  ;;  %v1026_v41 = vpop.permute.xlu0 %1025 }
 0x230   :  { %1028 = vst.msk [vmem:[#allocation3 + $0x54] sm:$0x1] %vm680_vm10, %v1026_v41 }
 0x232   :  { %v1033_v42 = vpop.permute.xlu1 %1032 }
 0x233   :  { %1035 = vst.msk [vmem:[#allocation3 + $0x55] sm:$0x1] %vm680_vm10, %v1033_v42  ;;  %1281 = vrot.lane.b32.xlu2 %v1258_v43, %s1459_s8  ;;  %v1077_v43 = vmul.f32 %v1808_v49, %v1757_v63 }
 0x237   :  { %v1122_v51 = vpop.permute.xlu2 %1121  ;;  %v1043_v54 = vpop.permute.xlu0 %1042 }
 0x238   :  { %v1147_v53 = vsel %vm1145_vm14, %v1122_v51, %v1626_v0  ;;  %v1044_v59 = vsel %vm723_vm12, %v1041_v18, %v1043_v54  ;;  %v1267_v18 = vrot.slane %v1228_v17, 1 }
 0x239   :  { %v1161_v58 = vadd.f32 %v1147_v53, %v1075_v52  ;;  %1046 = vst.msk [vmem:[#allocation3 + $0x56] sm:$0x1] %vm680_vm10, %v1044_v59 }
 0x23a   :  { %v1051_v55 = vpop.permute.xlu1 %1050 }
 0x23b   :  { %1053 = vst.msk [vmem:[#allocation3 + $0x57] sm:$0x1] %vm680_vm10, %v1051_v55  ;;  %1293 = vrot.lane.b32.xlu2 %v1265_v60, %s1459_s8  ;;  %v1206_v61 = vadd.f32 %v1744_v45, %v1161_v58 }
 0x23f   :  { %v1272_v62 = vpop.permute.xlu0 %1271  ;;  %v1270_v22 = vpop.permute.xlu2 %1269 }
 0x240   :  { %v1297_v29 = vsel %vm1145_vm14, %v1270_v22, %v1272_v62 }
 0x242   :  { %v1822_v1 = vld [vmem:[#allocation3 + $0x50] sm:$0xff]  ;;  %v1144_v25 = vpop.permute.xlu1 %1143 }
 0x243   :  { %v1099_v0 = vmul.f32 %v1552_v50, %v1822_v1  ;;  %v1225_v3 = vmul.f32 %v1668_v46, %v1822_v1  ;;  %v1175_v4 = vmul.f32 %v1692_v10, %v1822_v1  ;;  %v1268_v46 = vsel %vm1184_vm13, %v1675_v57, %v1267_v18 }
 0x245   :  { %1137 = vrot.lane.b32.xlu1 %v1099_v0, %s1459_s8  ;;  %v1261_v5 = vrot.slane %v1225_v3, 1  ;;  %v1194_v45 = vrot.slane %v1175_v4, 1  ;;  %v1079_v3 = vmul.f32 %v1808_v49, %v1822_v1 }
 0x247   :  { %v1266_v12 = vsel %vm1184_vm13, %v1261_v5, %v1265_v60  ;;  %v1195_v13 = vsel %vm1184_vm13, %v1192_v36, %v1194_v45  ;;  %v1835_v15 = vsel %vm1184_vm13, %v1194_v45, %v1196_v11  ;;  %v1284_v50 = vpop.permute.xlu0 %1283  ;;  %v1262_v10 = vsel %vm1184_vm13, %v1257_v38, %v1261_v5 }
 0x248   :  { %1289 = vrot.lane.b32.xlu0 %v1266_v12, %s1459_s8 }
 0x24d   :  { %1285 = vrot.lane.b32.xlu1 %v1262_v10, %s1459_s8 }
 0x24f   :  { %v1118_v20 = vpop.permute.xlu0 %1117 }
 0x250   :  { %1295 = vrot.lane.b32.xlu0 %v1267_v18, %s1459_s8  ;;  %v1146_v21 = vsel %vm1145_vm14, %v1118_v20, %v1629_v2  ;;  %v1280_v2 = vpop.permute.xlu1 %1279 }
 0x251   :  { %v1160_v23 = vadd.f32 %v1146_v21, %v1074_v19 }
 0x253   :  { %v1205_v28 = vadd.f32 %v1718_v24, %v1160_v23 }
 0x255   :  { %1291 = vrot.lane.b32.xlu1 %v1268_v46, %s1459_s8  ;;  %v1311_v32 = vadd.f32 %v1297_v29, %v1205_v28 }
 0x257   :  { %v1319_v33 = vadd.f32 %v1318_v31, %v1311_v32 }
 0x259   :  { %1326 = vst [vmem:[%s1907_s5] sm:$0xff] %v1319_v33 }
 0x267   :  { %v1126_v16 = vpop.permute.xlu1 %1125 }
 0x268   :  { %v1148_v57 = vsel %vm1145_vm14, %v1126_v16, %v1612_v48 }
 0x269   :  { %v1162_v24 = vadd.f32 %v1148_v57, %v1076_v34 }
 0x26b   :  { %v1207_v35 = vadd.f32 %v1767_v9, %v1162_v24 }
 0x26f   :  { %v1274_v36 = vpop.permute.xlu1 %1273 }
 0x270   :  { %v1298_v38 = vsel %vm1145_vm14, %v1274_v36, %v1779_v26  ;;  %v1078_v26 = vmul.f32 %v1808_v49, %v1785_v30 }
 0x271   :  { %v1312_v41 = vadd.f32 %v1298_v38, %v1206_v61 }
 0x273   :  { %v1320_v42 = vadd.f32 %v1318_v31, %v1312_v41 }
 0x275   :  { %1327 = vst [vmem:[%s1907_s5 + $0x8] sm:$0xff] %v1320_v42 }
 0x280   :  { %v1130_v39 = vpop.permute.xlu0 %1129 }
 0x281   :  { %v1149_v48 = vsel %vm1145_vm14, %v1130_v39, %v1639_v8 }
 0x282   :  { %v1163_v44 = vadd.f32 %v1149_v48, %v1077_v43 }
 0x284   :  { %v1208_v9 = vadd.f32 %v1799_v37, %v1163_v44 }
 0x285   :  { %v1134_v47 = vpop.permute.xlu2 %1133 }
 0x286   :  { %v1150_v51 = vsel %vm1145_vm14, %v1134_v47, %v1636_v7  ;;  %v1080_v7 = vmul.f32 %v1808_v49, %v1781_v27 }
 0x287   :  { %v1164_v52 = vadd.f32 %v1150_v51, %v1078_v26 }
 0x288   :  { %v1278_v53 = vpop.permute.xlu0 %1277 }
 0x289   :  { %v1299_v54 = vsel %vm1145_vm14, %v1278_v53, %v1280_v2  ;;  %v1209_v63 = vadd.f32 %v1195_v13, %v1164_v52 }
 0x28a   :  { %v1313_v55 = vadd.f32 %v1299_v54, %v1207_v35 }
 0x28c   :  { %v1321_v58 = vadd.f32 %v1318_v31, %v1313_v55 }
 0x28d   :  { %v1282_v8 = vpop.permute.xlu2 %1281 }
 0x28e   :  { %1328 = vst [vmem:[%s1907_s5 + $0x10] sm:$0xff] %v1321_v58  ;;  %v1300_v37 = vsel %vm1145_vm14, %v1282_v8, %v1284_v50 }
 0x28f   :  { %v1314_v59 = vadd.f32 %v1300_v37, %v1208_v9 }
 0x291   :  { %v1322_v60 = vadd.f32 %v1318_v31, %v1314_v59 }
 0x293   :  { %1329 = vst [vmem:[%s1907_s5 + $0x18] sm:$0xff] %v1322_v60 }
 0x295   :  { %v1294_v50 = vpop.permute.xlu2 %1293 }
 0x29c   :  { %v1142_v30 = vpop.permute.xlu0 %1141 }
 0x29d   :  { %v1152_v61 = vsel %vm1145_vm14, %v1142_v30, %v1144_v25 }
 0x29e   :  { %v1166_v62 = vadd.f32 %v1152_v61, %v1080_v7 }
 0x2a0   :  { %v1211_v14 = vadd.f32 %v1196_v11, %v1166_v62 }
 0x2b7   :  { %v1138_v0 = vpop.permute.xlu1 %1137 }
 0x2b8   :  { %v1151_v4 = vsel %vm1145_vm14, %v1138_v0, %v1618_v56 }
 0x2b9   :  { %v1165_v5 = vadd.f32 %v1151_v4, %v1079_v3 }
 0x2ba   :  { %v1290_v6 = vpop.permute.xlu0 %1289 }
 0x2bb   :  { %v1210_v45 = vadd.f32 %v1835_v15, %v1165_v5 }
 0x2bf   :  { %v1286_v12 = vpop.permute.xlu1 %1285 }
 0x2c0   :  { %v1301_v27 = vsel %vm1145_vm14, %v1286_v12, %v1801_v40 }
 0x2c1   :  { %v1315_v13 = vadd.f32 %v1301_v27, %v1209_v63 }
 0x2c2   :  { %v1296_v17 = vpop.permute.xlu0 %1295 }
 0x2c3   :  { %v1323_v10 = vadd.f32 %v1318_v31, %v1315_v13  ;;  %v1303_v11 = vsel %vm1145_vm14, %v1294_v50, %v1296_v17 }
 0x2c4   :  { %v1317_v18 = vadd.f32 %v1303_v11, %v1211_v14 }
 0x2c5   :  { %1330 = vst [vmem:[%s1907_s5 + $0x20] sm:$0xff] %v1323_v10 }
 0x2c6   :  { %v1325_v56 = vadd.f32 %v1318_v31, %v1317_v18 }
 0x2c7   :  { %v1292_v49 = vpop.permute.xlu1 %1291 }
 0x2c8   :  { %1332 = vst [vmem:[%s1907_s5 + $0x30] sm:$0x1] %v1325_v56  ;;  %v1302_v1 = vsel %vm1145_vm14, %v1290_v6, %v1292_v49 }
 0x2c9   :  { %v1316_v40 = vadd.f32 %v1302_v1, %v1210_v45 }
 0x2cb   :  { %v1324_v15 = vadd.f32 %v1318_v31, %v1316_v40 }
 0x2cd   :  { %1331 = vst [vmem:[%s1907_s5 + $0x28] sm:$0xff] %v1324_v15 }
 0x2ce   :  { %1337 = vsyncpa [#allocation5], 1 }
 0x2cf   :  { %1338 = vsyncpa [#allocation6], 1 }

</bundles_post_ra>
